<compile_context>
chip_gen: v5e
topology: v5e:2x2
jax: 0.10.0
libtpu: 0.0.40
codegen_flags: <defaults>
</compile_context>

<pallas_src>
import functools

import jax
import jax.numpy as jnp
from jax.experimental import pallas as pl
from jax.experimental.pallas import tpu as pltpu


# --------------------------------------------------------------------------------------
# Shared in-kernel gate math: spatial sums -> softmax scales (s0 for x, s1 for y).
# Everything here is tiny ((bt, 2c)-sized) and rides the MXU / EUP slots, fully hidden
# under the HBM streaming of x / y.
# --------------------------------------------------------------------------------------
def _gate_from_sums(xsum, ysum, inv_hw, w1t, w2t, w3t, seg):
    mid = seg.shape[1]
    attn0 = jnp.concatenate([xsum, ysum], axis=1) * inv_hw          # (bt, 2c) means
    # fc1 (bias-free) + ReLU on the MXU: (bt, 2c) @ (2c, mid*2c)
    temp = jnp.maximum(
        jnp.dot(attn0, w1t, preferred_element_type=jnp.float32), 0.0)   # (bt, mid*2c)
    # attn2[b, m] = <temp[b, m*2c:(m+1)*2c], attn0[b]>  (segmented reduce):
    # elementwise product with the lane-tiled attn0, then one matmul vs 0/1 selector.
    prod = temp * jnp.tile(attn0, (1, mid))                          # (bt, mid*2c)
    attn2 = jnp.dot(prod, seg, preferred_element_type=jnp.float32)   # (bt, mid)
    # fc2 / fc3 (bias-free) + sigmoid
    z1 = jnp.dot(attn2, w2t, preferred_element_type=jnp.float32)     # (bt, c)
    z2 = jnp.dot(attn2, w3t, preferred_element_type=jnp.float32)     # (bt, c)
    att1 = 1.0 / (1.0 + jnp.exp(-z1))
    att2 = 1.0 / (1.0 + jnp.exp(-z2))
    # softmax over the concatenation [att1, att2] (2c entries per batch row)
    mmax = jnp.maximum(jnp.max(att1, axis=1, keepdims=True),
                       jnp.max(att2, axis=1, keepdims=True))
    e1 = jnp.exp(att1 - mmax)
    e2 = jnp.exp(att2 - mmax)
    denom = (jnp.sum(e1, axis=1, keepdims=True) +
             jnp.sum(e2, axis=1, keepdims=True))
    inv = pl.reciprocal(denom, approx=True)      # EUP slot
    inv = inv * (2.0 - denom * inv)              # one Newton step -> full precision
    return e1 * inv, e2 * inv                    # (bt, c) each


# --------------------------------------------------------------------------------------
# Path A (common): the whole (bt, c, hw) slab fits in VMEM -> one fused streaming kernel.
# --------------------------------------------------------------------------------------
def _dsb_fused_kernel(inv_hw, x_ref, y_ref, w1t_ref, w2t_ref, w3t_ref, seg_ref, o_ref):
    x = x_ref[...]                                   # (bt, c, hw) f32
    y = y_ref[...]
    # Spatial sums. (If a bundle dump ever shows the VALU reduction exposed on v6e,
    # this could ride the MXU via a matmul against a ones vector — not needed now,
    # it is hidden under the HBM stream.)
    xm = jnp.sum(x, axis=2)
    ym = jnp.sum(y, axis=2)
    s0, s1 = _gate_from_sums(xm, ym, inv_hw,
                             w1t_ref[...], w2t_ref[...], w3t_ref[...], seg_ref[...])
    # Single fused store, broadcast over spatial lanes.
    o_ref[...] = x * s0[:, :, None] + y * s1[:, :, None]


# --------------------------------------------------------------------------------------
# Path B (large feature maps): hw-split fallback.
# Kernel B1: accumulate spatial sums over hw tiles, emit softmax scales at the last tile.
# Kernel B2: hw-tiled gated blend.
# --------------------------------------------------------------------------------------
def _dsb_gate_kernel(inv_hw, hw_true, thw,
                     x_ref, y_ref, w1t_ref, w2t_ref, w3t_ref, seg_ref,
                     s0_ref, s1_ref, xsum_ref, ysum_ref):
    k = pl.program_id(1)

    @pl.when(k == 0)
    def _():
        xsum_ref[...] = jnp.zeros_like(xsum_ref)
        ysum_ref[...] = jnp.zeros_like(ysum_ref)

    x = x_ref[...]                                   # (btg, c, thw)
    y = y_ref[...]
    # Mask the padded tail columns of the last (partial) hw tile so the mean is exact.
    col = jax.lax.broadcasted_iota(jnp.int32, x.shape, 2) + k * thw
    valid = col < hw_true
    xsum_ref[...] += jnp.sum(jnp.where(valid, x, 0.0), axis=2)
    ysum_ref[...] += jnp.sum(jnp.where(valid, y, 0.0), axis=2)

    @pl.when(k == pl.num_programs(1) - 1)
    def _():
        s0, s1 = _gate_from_sums(xsum_ref[...], ysum_ref[...], inv_hw,
                                 w1t_ref[...], w2t_ref[...], w3t_ref[...], seg_ref[...])
        s0_ref[...] = s0[:, :, None]                 # (btg, c, 1)
        s1_ref[...] = s1[:, :, None]


def _dsb_blend_kernel(x_ref, y_ref, s0_ref, s1_ref, o_ref):
    o_ref[...] = x_ref[...] * s0_ref[...] + y_ref[...] * s1_ref[...]


# --------------------------------------------------------------------------------------
# Wrapper
# --------------------------------------------------------------------------------------
def _vmem_capacity_bytes():
    cap = 64 << 20                                   # conservative default (v7x per-TC)
    try:
        info = pltpu.get_tpu_info()
        v = getattr(info, "vmem_capacity_bytes", None)
        if v:
            cap = int(v)
    except Exception:
        pass
    return cap


def prepare_dsb_params(w1, w2, w3, dtype=jnp.float32):
    """One-time (model-init) weight prep: pre-transpose + build the segmented-reduce
    selector so neither lands in the per-forward hot path."""
    C = w1.shape[1]                                  # module "channels" = 2*c
    mid = C // 16
    c = C // 2
    assert w1.shape == (mid * C, C) and w2.shape == (c, mid) and w3.shape == (c, mid)
    w1t = jnp.asarray(w1, dtype).T                   # (2c, mid*2c)
    w2t = jnp.asarray(w2, dtype).T                   # (mid, c)
    w3t = jnp.asarray(w3, dtype).T                   # (mid, c)
    seg = (jnp.arange(mid * C)[:, None] // C ==
           jnp.arange(mid)[None, :]).astype(dtype)   # (mid*2c, mid) 0/1 selector
    # TODO(synk): optionally store w1t in bf16 (MXU-native, f32 accumulate) to halve
    # its VMEM residency for very large C; kept f32 here to match the torch numerics.
    return dict(w1t=w1t, w2t=w2t, w3t=w3t, seg=seg)


def _wspec_kwargs(single_buffer):
    # Grid-invariant operands: single-buffer them (their index_map is constant), so
    # their VMEM residency is halved and the streaming tiles can grow instead.
    if single_buffer and hasattr(pl, "Buffered"):
        return dict(pipeline_mode=pl.Buffered(1))
    return {}


def dynamic_select_block(x, y, params, *, force_hw_split=False, max_hw_tile=None):
    """x, y: (b, c, h, w) float32. params: output of prepare_dsb_params()."""
    b, c, h, w = x.shape
    C = 2 * c
    assert C % 16 == 0, "constructor channels (=2c) must be divisible by 16"
    mid = C // 16
    hw = h * w
    inv_hw = 1.0 / float(hw)
    itemsize = 4

    w1t, w2t, w3t, seg = params["w1t"], params["w2t"], params["w3t"], params["seg"]
    assert w1t.shape == (C, mid * C) and w2t.shape == (mid, c) and w3t.shape == (mid, c)

    # Collapsing trailing dims is layout-free (no HBM copy).
    xr = x.reshape(b, c, hw)
    yr = y.reshape(b, c, hw)

    # ---- generation-aware VMEM budget --------------------------------------------
    capacity = _vmem_capacity_bytes()                 # 128 MiB v5e/v6e, 64 MiB v7x
    usable = (capacity * 3) // 4                      # ~96 MiB / ~48 MiB working budget
    slack = 6 << 20                                   # Mosaic internal scratch headroom
    wbytes_single = int(sum(a.size for a in (w1t, w2t, w3t, seg))) * itemsize
    per_batch_bytes = c * hw * itemsize               # one (c, hw) f32 slab

    stream_budget = max(usable - wbytes_single - slack, 0)
    per_tensor_cap = stream_budget // 6               # x, y, out each double-buffered
    gen_target = (12 << 20) if capacity >= (96 << 20) else (6 << 20)
    per_tensor_target = min(per_tensor_cap, gen_target)

    use_fused = (not force_hw_split) and (0 < per_batch_bytes <= per_tensor_cap)

    if use_fused:
        # -------- Path A: single fused streaming kernel ----------------------------
        bt = max(1, min(per_tensor_target // per_batch_bytes, b))
        if b > 1:
            bt = min(bt, (b + 1) // 2)                # >= 2 grid steps: both v7x TCs stream
        tile_bytes = bt * per_batch_bytes
        grid = (pl.cdiv(b, bt),)                      # no b % bt requirement (masked tail)

        def run(single_buffer):
            wkw = _wspec_kwargs(single_buffer)
            wbytes = wbytes_single * (1 if single_buffer else 2)
            vmem_limit = int(min(usable, max(6 * tile_bytes + wbytes + slack, 32 << 20)))
            kernel = functools.partial(_dsb_fused_kernel, inv_hw)
            return pl.pallas_call(
                kernel,
                grid=grid,
                in_specs=[
                    pl.BlockSpec((bt, c, hw), lambda i: (i, 0, 0)),
                    pl.BlockSpec((bt, c, hw), lambda i: (i, 0, 0)),
                    pl.BlockSpec((C, mid * C), lambda i: (0, 0), **wkw),
                    pl.BlockSpec((mid, c), lambda i: (0, 0), **wkw),
                    pl.BlockSpec((mid, c), lambda i: (0, 0), **wkw),
                    pl.BlockSpec((mid * C, mid), lambda i: (0, 0), **wkw),
                ],
                out_specs=pl.BlockSpec((bt, c, hw), lambda i: (i, 0, 0)),
                out_shape=jax.ShapeDtypeStruct((b, c, hw), xr.dtype),
                compiler_params=pltpu.CompilerParams(
                    dimension_semantics=("parallel",),
                    vmem_limit_bytes=vmem_limit,
                ),
            )(xr, yr, w1t, w2t, w3t, seg)

        try:
            out = run(True)
        except Exception:           # pragma: no cover - fallback if Buffered(1) rejected
            out = run(False)
        return out.reshape(b, c, h, w)

    # -------- Path B: hw-split (large c*hw, or forced for testing) --------------------
    # TODO(synk): if w1t itself (~C^3/16 floats) ever overflows the VMEM budget, chunk
    # it over an extra grid axis; not needed for FPN-scale channel counts.
    def pick_hw_tile(n_stream_bufs, wbytes):
        budget = max(usable - wbytes - slack, 1 << 20)
        per_tensor = budget // n_stream_bufs
        t = (per_tensor // (c * itemsize)) // 128 * 128
        t = min(hw, max(128, int(t)))                 # multiple of 128, or the full hw
        if max_hw_tile is not None:
            t = min(t, int(max_hw_tile))
        return t

    # B1: means + gate (streams x, y once; outputs are tiny (b, c, 1) scale tensors).
    thw_g = pick_hw_tile(4, wbytes_single)
    btg = 1

    def run_gate(single_buffer):
        wkw = _wspec_kwargs(single_buffer)
        wbytes = wbytes_single * (1 if single_buffer else 2)
        vmem_limit = int(min(usable,
                             max(4 * btg * c * thw_g * itemsize + wbytes + slack,
                                 32 << 20)))
        kernel = functools.partial(_dsb_gate_kernel, inv_hw, hw, thw_g)
        return pl.pallas_call(
            kernel,
            grid=(pl.cdiv(b, btg), pl.cdiv(hw, thw_g)),
            in_specs=[
                pl.BlockSpec((btg, c, thw_g), lambda i, k: (i, 0, k)),
                pl.BlockSpec((btg, c, thw_g), lambda i, k: (i, 0, k)),
                pl.BlockSpec((C, mid * C), lambda i, k: (0, 0), **wkw),
                pl.BlockSpec((mid, c), lambda i, k: (0, 0), **wkw),
                pl.BlockSpec((mid, c), lambda i, k: (0, 0), **wkw),
                pl.BlockSpec((mid * C, mid), lambda i, k: (0, 0), **wkw),
            ],
            out_specs=[
                pl.BlockSpec((btg, c, 1), lambda i, k: (i, 0, 0)),
                pl.BlockSpec((btg, c, 1), lambda i, k: (i, 0, 0)),
            ],
            out_shape=[
                jax.ShapeDtypeStruct((b, c, 1), xr.dtype),
                jax.ShapeDtypeStruct((b, c, 1), xr.dtype),
            ],
            scratch_shapes=[
                pltpu.VMEM((btg, c), jnp.float32),
                pltpu.VMEM((btg, c), jnp.float32),
            ],
            compiler_params=pltpu.CompilerParams(
                dimension_semantics=("parallel", "arbitrary"),
                vmem_limit_bytes=vmem_limit,
            ),
        )(xr, yr, w1t, w2t, w3t, seg)

    try:
        s0, s1 = run_gate(True)
    except Exception:               # pragma: no cover - fallback if Buffered(1) rejected
        s0, s1 = run_gate(False)

    # B2: hw-tiled gated blend (streams x, y again + writes out).
    thw_b = pick_hw_tile(6, 0)
    btb = 1
    vmem_limit_b = int(min(usable,
                           max(6 * btb * c * thw_b * itemsize + slack, 32 << 20)))
    out = pl.pallas_call(
        _dsb_blend_kernel,
        grid=(pl.cdiv(b, btb), pl.cdiv(hw, thw_b)),
        in_specs=[
            pl.BlockSpec((btb, c, thw_b), lambda i, k: (i, 0, k)),
            pl.BlockSpec((btb, c, thw_b), lambda i, k: (i, 0, k)),
            pl.BlockSpec((btb, c, 1), lambda i, k: (i, 0, 0)),
            pl.BlockSpec((btb, c, 1), lambda i, k: (i, 0, 0)),
        ],
        out_specs=pl.BlockSpec((btb, c, thw_b), lambda i, k: (i, 0, k)),
        out_shape=jax.ShapeDtypeStruct((b, c, hw), xr.dtype),
        compiler_params=pltpu.CompilerParams(
            dimension_semantics=("parallel", "parallel"),
            vmem_limit_bytes=vmem_limit_b,
        ),
    )(xr, yr, s0, s1)
    return out.reshape(b, c, h, w)


# --------------------------------------------------------------------------------------
# Pure-JAX reference (mirror of the PyTorch forward) for validation.
# --------------------------------------------------------------------------------------
def _reference(x, y, w1, w2, w3):
    b, c, h, w = x.shape
    C = 2 * c
    mid = C // 16
    attn = jnp.concatenate([x, y], axis=1).mean(axis=(2, 3))            # (b, 2c)
    temp = jax.nn.relu(attn @ w1.T).reshape(b, mid, C)                  # (b, mid, 2c)
    attn2 = jnp.einsum("bmc,bc->bm", temp, attn)                        # (b, mid)
    att1 = jax.nn.sigmoid(attn2 @ w2.T)                                 # (b, c)
    att2 = jax.nn.sigmoid(attn2 @ w3.T)                                 # (b, c)
    s = jax.nn.softmax(jnp.concatenate([att1, att2], axis=1), axis=1)   # (b, 2c)
    s0 = s[:, :c].reshape(b, c, 1, 1)
    s1 = s[:, c:].reshape(b, c, 1, 1)
    return x * s0 + y * s1


if __name__ == "__main__":
    key = jax.random.PRNGKey(0)
    # hw = 16*15 = 240 (not a multiple of 128) deliberately exercises the
    # no-pad / masked-tail paths that the perf review asked for.
    b, c, h, w = 2, 16, 16, 15            # per-input channels c=16 -> module channels C=32
    C = 2 * c
    mid = C // 16

    k1, k2, k3, k4, k5 = jax.random.split(key, 5)
    x = jax.random.normal(k1, (b, c, h, w), jnp.float32)
    y = jax.random.normal(k2, (b, c, h, w), jnp.float32)
    # Deterministic synthetic parameters (bias-free Linear layers, as in the module).
    w1 = jax.random.normal(k3, (C * C // 16, C), jnp.float32) / jnp.sqrt(C)      # fc1
    w2 = jax.random.normal(k4, (C // 2, C // 16), jnp.float32) / jnp.sqrt(mid)   # fc2
    w3 = jax.random.normal(k5, (C // 2, C // 16), jnp.float32) / jnp.sqrt(mid)   # fc3

    params = prepare_dsb_params(w1, w2, w3)        # hoisted out of the forward
    ref = _reference(x, y, w1, w2, w3)

    # Path A: fused single-pass streaming kernel.
    out = jax.block_until_ready(dynamic_select_block(x, y, params))
    assert out.shape == (b, c, h, w)
    err = float(jnp.max(jnp.abs(out - ref)))
    assert jnp.allclose(out, ref, atol=1e-4, rtol=1e-4), f"fused path mismatch: {err}"

    # Path B: hw-split fallback (forced, with a 128-lane tile so the accumulate +
    # tail-mask + blend machinery is exercised at this small shape).
    out2 = jax.block_until_ready(
        dynamic_select_block(x, y, params, force_hw_split=True, max_hw_tile=128))
    err2 = float(jnp.max(jnp.abs(out2 - ref)))
    assert jnp.allclose(out2, ref, atol=1e-4, rtol=1e-4), f"hw-split path mismatch: {err2}"

    print("KERNEL_OK")
</pallas_src>

<mosaic_0001>
module attributes {stable_mosaic.version = 11 : i64} {
  func.func @_dsb_fused_kernel(%arg0: i32, %arg1: memref<1x16x240xf32, #tpu.memory_space<vmem>>, %arg2: memref<1x16x240xf32, #tpu.memory_space<vmem>>, %arg3: memref<32x64xf32, #tpu.memory_space<vmem>>, %arg4: memref<2x16xf32, #tpu.memory_space<vmem>>, %arg5: memref<2x16xf32, #tpu.memory_space<vmem>>, %arg6: memref<64x2xf32, #tpu.memory_space<vmem>>, %arg7: memref<1x16x240xf32, #tpu.memory_space<vmem>>) attributes {dimension_semantics = [#tpu.dimension_semantics<parallel>], iteration_bounds = array<i64: 2>, scalar_prefetch = 0 : i64, scratch_operands = 0 : i64, tpu.core_type = #tpu.core_type<tc>, window_params = [{transform_indices = @transform_0, window_bounds = array<i64: 1, 16, 240>}, {transform_indices = @transform_1, window_bounds = array<i64: 1, 16, 240>}, {pipeline_mode = #tpu.pipeline_mode<synchronous>, transform_indices = @transform_2, window_bounds = array<i64: 32, 64>}, {pipeline_mode = #tpu.pipeline_mode<synchronous>, transform_indices = @transform_3, window_bounds = array<i64: 2, 16>}, {pipeline_mode = #tpu.pipeline_mode<synchronous>, transform_indices = @transform_4, window_bounds = array<i64: 2, 16>}, {pipeline_mode = #tpu.pipeline_mode<synchronous>, transform_indices = @transform_5, window_bounds = array<i64: 64, 2>}, {transform_indices = @transform_6, window_bounds = array<i64: 1, 16, 240>}]} {
    %c0 = arith.constant 0 : index
    %c0_0 = arith.constant 0 : index
    %c0_1 = arith.constant 0 : index
    %0 = vector.load %arg1[%c0, %c0_0, %c0_1] : memref<1x16x240xf32, #tpu.memory_space<vmem>>, vector<1x16x240xf32>
    %c0_2 = arith.constant 0 : index
    %c0_3 = arith.constant 0 : index
    %c0_4 = arith.constant 0 : index
    %1 = vector.load %arg2[%c0_2, %c0_3, %c0_4] : memref<1x16x240xf32, #tpu.memory_space<vmem>>, vector<1x16x240xf32>
    %cst = arith.constant dense<0.000000e+00> : vector<1x16xf32>
    %2 = vector.multi_reduction <add>, %0, %cst [2] : vector<1x16x240xf32> to vector<1x16xf32>
    %cst_5 = arith.constant dense<0.000000e+00> : vector<1x16xf32>
    %3 = vector.multi_reduction <add>, %1, %cst_5 [2] : vector<1x16x240xf32> to vector<1x16xf32>
    %c0_6 = arith.constant 0 : index
    %c0_7 = arith.constant 0 : index
    %4 = vector.load %arg3[%c0_6, %c0_7] : memref<32x64xf32, #tpu.memory_space<vmem>>, vector<32x64xf32>
    %c0_8 = arith.constant 0 : index
    %c0_9 = arith.constant 0 : index
    %5 = vector.load %arg4[%c0_8, %c0_9] : memref<2x16xf32, #tpu.memory_space<vmem>>, vector<2x16xf32>
    %c0_10 = arith.constant 0 : index
    %c0_11 = arith.constant 0 : index
    %6 = vector.load %arg5[%c0_10, %c0_11] : memref<2x16xf32, #tpu.memory_space<vmem>>, vector<2x16xf32>
    %c0_12 = arith.constant 0 : index
    %c0_13 = arith.constant 0 : index
    %7 = vector.load %arg6[%c0_12, %c0_13] : memref<64x2xf32, #tpu.memory_space<vmem>>, vector<64x2xf32>
    %8 = tpu.concatenate %2, %3 in 1 : vector<1x16xf32>, vector<1x16xf32> -> vector<1x32xf32>
    %cst_14 = arith.constant 0.00416666688 : f32
    %9 = vector.broadcast %cst_14 : f32 to vector<1x32xf32>
    %10 = arith.mulf %8, %9 : vector<1x32xf32>
    %cst_15 = arith.constant dense<0.000000e+00> : vector<1x64xf32>
    %11 = tpu.matmul %10, %4, %cst_15 {dimension_numbers = #tpu.dot_dimension_numbers<[1], [0], [0], [1], [0, 0, 1, 1], [], []>} : vector<1x32xf32>, vector<32x64xf32>, vector<1x64xf32> -> vector<1x64xf32>
    %cst_16 = arith.constant 0.000000e+00 : f32
    %12 = vector.broadcast %cst_16 : f32 to vector<1x64xf32>
    %13 = arith.maximumf %11, %12 : vector<1x64xf32>
    %14 = tpu.concatenate %10, %10 in 1 : vector<1x32xf32>, vector<1x32xf32> -> vector<1x64xf32>
    %15 = arith.mulf %13, %14 : vector<1x64xf32>
    %cst_17 = arith.constant dense<0.000000e+00> : vector<1x2xf32>
    %16 = tpu.matmul %15, %7, %cst_17 {dimension_numbers = #tpu.dot_dimension_numbers<[1], [0], [0], [1], [0, 0, 1, 1], [], []>} : vector<1x64xf32>, vector<64x2xf32>, vector<1x2xf32> -> vector<1x2xf32>
    %cst_18 = arith.constant dense<0.000000e+00> : vector<1x16xf32>
    %17 = tpu.matmul %16, %5, %cst_18 {dimension_numbers = #tpu.dot_dimension_numbers<[1], [0], [0], [1], [0, 0, 1, 1], [], []>} : vector<1x2xf32>, vector<2x16xf32>, vector<1x16xf32> -> vector<1x16xf32>
    %cst_19 = arith.constant dense<0.000000e+00> : vector<1x16xf32>
    %18 = tpu.matmul %16, %6, %cst_19 {dimension_numbers = #tpu.dot_dimension_numbers<[1], [0], [0], [1], [0, 0, 1, 1], [], []>} : vector<1x2xf32>, vector<2x16xf32>, vector<1x16xf32> -> vector<1x16xf32>
    %cst_20 = arith.constant 0.000000e+00 : f32
    %19 = vector.broadcast %cst_20 : f32 to vector<1x16xf32>
    %20 = arith.subf %19, %17 : vector<1x16xf32>
    %21 = math.exp %20 : vector<1x16xf32>
    %cst_21 = arith.constant 1.000000e+00 : f32
    %22 = vector.broadcast %cst_21 : f32 to vector<1x16xf32>
    %23 = arith.addf %22, %21 : vector<1x16xf32>
    %cst_22 = arith.constant 1.000000e+00 : f32
    %24 = vector.broadcast %cst_22 : f32 to vector<1x16xf32>
    %25 = arith.divf %24, %23 : vector<1x16xf32>
    %cst_23 = arith.constant 0.000000e+00 : f32
    %26 = vector.broadcast %cst_23 : f32 to vector<1x16xf32>
    %27 = arith.subf %26, %18 : vector<1x16xf32>
    %28 = math.exp %27 : vector<1x16xf32>
    %cst_24 = arith.constant 1.000000e+00 : f32
    %29 = vector.broadcast %cst_24 : f32 to vector<1x16xf32>
    %30 = arith.addf %29, %28 : vector<1x16xf32>
    %cst_25 = arith.constant 1.000000e+00 : f32
    %31 = vector.broadcast %cst_25 : f32 to vector<1x16xf32>
    %32 = arith.divf %31, %30 : vector<1x16xf32>
    %cst_26 = arith.constant dense<0xFF800000> : vector<1xf32>
    %33 = vector.multi_reduction <maximumf>, %25, %cst_26 [1] : vector<1x16xf32> to vector<1xf32>
    %34 = vector.shape_cast %33 : vector<1xf32> to vector<1x1xf32>
    %cst_27 = arith.constant dense<0xFF800000> : vector<1xf32>
    %35 = vector.multi_reduction <maximumf>, %32, %cst_27 [1] : vector<1x16xf32> to vector<1xf32>
    %36 = vector.shape_cast %35 : vector<1xf32> to vector<1x1xf32>
    %37 = arith.maximumf %34, %36 : vector<1x1xf32>
    %38 = vector.broadcast %37 : vector<1x1xf32> to vector<1x16xf32>
    %39 = arith.subf %25, %38 : vector<1x16xf32>
    %40 = math.exp %39 : vector<1x16xf32>
    %41 = vector.broadcast %37 : vector<1x1xf32> to vector<1x16xf32>
    %42 = arith.subf %32, %41 : vector<1x16xf32>
    %43 = math.exp %42 : vector<1x16xf32>
    %cst_28 = arith.constant dense<0.000000e+00> : vector<1xf32>
    %44 = vector.multi_reduction <add>, %40, %cst_28 [1] : vector<1x16xf32> to vector<1xf32>
    %45 = vector.shape_cast %44 : vector<1xf32> to vector<1x1xf32>
    %cst_29 = arith.constant dense<0.000000e+00> : vector<1xf32>
    %46 = vector.multi_reduction <add>, %43, %cst_29 [1] : vector<1x16xf32> to vector<1xf32>
    %47 = vector.shape_cast %46 : vector<1xf32> to vector<1x1xf32>
    %48 = arith.addf %45, %47 : vector<1x1xf32>
    %49 = tpu.reciprocal %48 {approx = true} : vector<1x1xf32> -> vector<1x1xf32>
    %50 = arith.mulf %48, %49 : vector<1x1xf32>
    %cst_30 = arith.constant 2.000000e+00 : f32
    %51 = vector.broadcast %cst_30 : f32 to vector<1x1xf32>
    %52 = arith.subf %51, %50 : vector<1x1xf32>
    %53 = arith.mulf %49, %52 : vector<1x1xf32>
    %54 = vector.broadcast %53 : vector<1x1xf32> to vector<1x16xf32>
    %55 = arith.mulf %40, %54 : vector<1x16xf32>
    %56 = vector.broadcast %53 : vector<1x1xf32> to vector<1x16xf32>
    %57 = arith.mulf %43, %56 : vector<1x16xf32>
    %58 = vector.shape_cast %55 : vector<1x16xf32> to vector<1x16x1xf32>
    %59 = vector.broadcast %58 : vector<1x16x1xf32> to vector<1x16x240xf32>
    %60 = arith.mulf %0, %59 : vector<1x16x240xf32>
    %61 = vector.shape_cast %57 : vector<1x16xf32> to vector<1x16x1xf32>
    %62 = vector.broadcast %61 : vector<1x16x1xf32> to vector<1x16x240xf32>
    %63 = arith.mulf %1, %62 : vector<1x16x240xf32>
    %64 = arith.addf %60, %63 : vector<1x16x240xf32>
    %c0_31 = arith.constant 0 : index
    %c0_32 = arith.constant 0 : index
    %c0_33 = arith.constant 0 : index
    %65 = vector.load %arg7[%c0_31, %c0_32, %c0_33] : memref<1x16x240xf32, #tpu.memory_space<vmem>>, vector<1x16x240xf32>
    tpu.vector_store %arg7[%c0_31, %c0_32, %c0_33], %64 {strides = array<i32>} : memref<1x16x240xf32, #tpu.memory_space<vmem>>, vector<1x16x240xf32>,
    return
  }
  func.func @transform_0(%arg0: i32) -> (i32, i32, i32) {
    %c0_i32 = arith.constant 0 : i32
    %c0_i32_0 = arith.constant 0 : i32
    %c0_i32_1 = arith.constant 0 : i32
    return %arg0, %c0_i32, %c0_i32_0 : i32, i32, i32
  }
  func.func @transform_1(%arg0: i32) -> (i32, i32, i32) {
    %c0_i32 = arith.constant 0 : i32
    %c0_i32_0 = arith.constant 0 : i32
    %c0_i32_1 = arith.constant 0 : i32
    return %arg0, %c0_i32, %c0_i32_0 : i32, i32, i32
  }
  func.func @transform_2(%arg0: i32) -> (i32, i32) {
    %c0_i32 = arith.constant 0 : i32
    %c0_i32_0 = arith.constant 0 : i32
    %c0_i32_1 = arith.constant 0 : i32
    return %c0_i32, %c0_i32_0 : i32, i32
  }
  func.func @transform_3(%arg0: i32) -> (i32, i32) {
    %c0_i32 = arith.constant 0 : i32
    %c0_i32_0 = arith.constant 0 : i32
    %c0_i32_1 = arith.constant 0 : i32
    return %c0_i32, %c0_i32_0 : i32, i32
  }
  func.func @transform_4(%arg0: i32) -> (i32, i32) {
    %c0_i32 = arith.constant 0 : i32
    %c0_i32_0 = arith.constant 0 : i32
    %c0_i32_1 = arith.constant 0 : i32
    return %c0_i32, %c0_i32_0 : i32, i32
  }
  func.func @transform_5(%arg0: i32) -> (i32, i32) {
    %c0_i32 = arith.constant 0 : i32
    %c0_i32_0 = arith.constant 0 : i32
    %c0_i32_1 = arith.constant 0 : i32
    return %c0_i32, %c0_i32_0 : i32, i32
  }
  func.func @transform_6(%arg0: i32) -> (i32, i32, i32) {
    %c0_i32 = arith.constant 0 : i32
    %c0_i32_0 = arith.constant 0 : i32
    %c0_i32_1 = arith.constant 0 : i32
    return %arg0, %c0_i32, %c0_i32_0 : i32, i32, i32
  }
}

module attributes {stable_mosaic.version = 11 : i64} {
  func.func @_dsb_fused_kernel(%arg0: i32, %arg1: memref<1x16x240xf32, #tpu.memory_space<vmem>>, %arg2: memref<1x16x240xf32, #tpu.memory_space<vmem>>, %arg3: memref<32x64xf32, #tpu.memory_space<vmem>>, %arg4: memref<2x16xf32, #tpu.memory_space<vmem>>, %arg5: memref<2x16xf32, #tpu.memory_space<vmem>>, %arg6: memref<64x2xf32, #tpu.memory_space<vmem>>, %arg7: memref<1x16x240xf32, #tpu.memory_space<vmem>>) attributes {dimension_semantics = [#tpu.dimension_semantics<parallel>], iteration_bounds = array<i64: 2>, scalar_prefetch = 0 : i64, scratch_operands = 0 : i64, tpu.core_type = #tpu.core_type<tc>, window_params = [{transform_indices = @transform_0, window_bounds = array<i64: 1, 16, 240>}, {transform_indices = @transform_1, window_bounds = array<i64: 1, 16, 240>}, {pipeline_mode = #tpu.pipeline_mode<synchronous>, transform_indices = @transform_2, window_bounds = array<i64: 32, 64>}, {pipeline_mode = #tpu.pipeline_mode<synchronous>, transform_indices = @transform_3, window_bounds = array<i64: 2, 16>}, {pipeline_mode = #tpu.pipeline_mode<synchronous>, transform_indices = @transform_4, window_bounds = array<i64: 2, 16>}, {pipeline_mode = #tpu.pipeline_mode<synchronous>, transform_indices = @transform_5, window_bounds = array<i64: 64, 2>}, {transform_indices = @transform_6, window_bounds = array<i64: 1, 16, 240>}]} {
    %c0 = arith.constant 0 : index
    %c0_0 = arith.constant 0 : index
    %c0_1 = arith.constant 0 : index
    %0 = vector.load %arg1[%c0, %c0_0, %c0_1] : memref<1x16x240xf32, #tpu.memory_space<vmem>>, vector<1x16x240xf32>
    %c0_2 = arith.constant 0 : index
    %c0_3 = arith.constant 0 : index
    %c0_4 = arith.constant 0 : index
    %1 = vector.load %arg2[%c0_2, %c0_3, %c0_4] : memref<1x16x240xf32, #tpu.memory_space<vmem>>, vector<1x16x240xf32>
    %cst = arith.constant dense<0.000000e+00> : vector<1x16xf32>
    %2 = vector.multi_reduction <add>, %0, %cst [2] : vector<1x16x240xf32> to vector<1x16xf32>
    %cst_5 = arith.constant dense<0.000000e+00> : vector<1x16xf32>
    %3 = vector.multi_reduction <add>, %1, %cst_5 [2] : vector<1x16x240xf32> to vector<1x16xf32>
    %c0_6 = arith.constant 0 : index
    %c0_7 = arith.constant 0 : index
    %4 = vector.load %arg3[%c0_6, %c0_7] : memref<32x64xf32, #tpu.memory_space<vmem>>, vector<32x64xf32>
    %c0_8 = arith.constant 0 : index
    %c0_9 = arith.constant 0 : index
    %5 = vector.load %arg4[%c0_8, %c0_9] : memref<2x16xf32, #tpu.memory_space<vmem>>, vector<2x16xf32>
    %c0_10 = arith.constant 0 : index
    %c0_11 = arith.constant 0 : index
    %6 = vector.load %arg5[%c0_10, %c0_11] : memref<2x16xf32, #tpu.memory_space<vmem>>, vector<2x16xf32>
    %c0_12 = arith.constant 0 : index
    %c0_13 = arith.constant 0 : index
    %7 = vector.load %arg6[%c0_12, %c0_13] : memref<64x2xf32, #tpu.memory_space<vmem>>, vector<64x2xf32>
    %8 = tpu.concatenate %2, %3 in 1 : vector<1x16xf32>, vector<1x16xf32> -> vector<1x32xf32>
    %cst_14 = arith.constant 0.00416666688 : f32
    %9 = vector.broadcast %cst_14 : f32 to vector<1x32xf32>
    %10 = arith.mulf %8, %9 : vector<1x32xf32>
    %cst_15 = arith.constant dense<0.000000e+00> : vector<1x64xf32>
    %11 = tpu.matmul %10, %4, %cst_15 {dimension_numbers = #tpu.dot_dimension_numbers<[1], [0], [0], [1], [0, 0, 1, 1], [], []>} : vector<1x32xf32>, vector<32x64xf32>, vector<1x64xf32> -> vector<1x64xf32>
    %cst_16 = arith.constant 0.000000e+00 : f32
    %12 = vector.broadcast %cst_16 : f32 to vector<1x64xf32>
    %13 = arith.maximumf %11, %12 : vector<1x64xf32>
    %14 = tpu.concatenate %10, %10 in 1 : vector<1x32xf32>, vector<1x32xf32> -> vector<1x64xf32>
    %15 = arith.mulf %13, %14 : vector<1x64xf32>
    %cst_17 = arith.constant dense<0.000000e+00> : vector<1x2xf32>
    %16 = tpu.matmul %15, %7, %cst_17 {dimension_numbers = #tpu.dot_dimension_numbers<[1], [0], [0], [1], [0, 0, 1, 1], [], []>} : vector<1x64xf32>, vector<64x2xf32>, vector<1x2xf32> -> vector<1x2xf32>
    %cst_18 = arith.constant dense<0.000000e+00> : vector<1x16xf32>
    %17 = tpu.matmul %16, %5, %cst_18 {dimension_numbers = #tpu.dot_dimension_numbers<[1], [0], [0], [1], [0, 0, 1, 1], [], []>} : vector<1x2xf32>, vector<2x16xf32>, vector<1x16xf32> -> vector<1x16xf32>
    %cst_19 = arith.constant dense<0.000000e+00> : vector<1x16xf32>
    %18 = tpu.matmul %16, %6, %cst_19 {dimension_numbers = #tpu.dot_dimension_numbers<[1], [0], [0], [1], [0, 0, 1, 1], [], []>} : vector<1x2xf32>, vector<2x16xf32>, vector<1x16xf32> -> vector<1x16xf32>
    %cst_20 = arith.constant 0.000000e+00 : f32
    %19 = vector.broadcast %cst_20 : f32 to vector<1x16xf32>
    %20 = arith.subf %19, %17 : vector<1x16xf32>
    %21 = math.exp %20 : vector<1x16xf32>
    %cst_21 = arith.constant 1.000000e+00 : f32
    %22 = vector.broadcast %cst_21 : f32 to vector<1x16xf32>
    %23 = arith.addf %22, %21 : vector<1x16xf32>
    %cst_22 = arith.constant 1.000000e+00 : f32
    %24 = vector.broadcast %cst_22 : f32 to vector<1x16xf32>
    %25 = arith.divf %24, %23 : vector<1x16xf32>
    %cst_23 = arith.constant 0.000000e+00 : f32
    %26 = vector.broadcast %cst_23 : f32 to vector<1x16xf32>
    %27 = arith.subf %26, %18 : vector<1x16xf32>
    %28 = math.exp %27 : vector<1x16xf32>
    %cst_24 = arith.constant 1.000000e+00 : f32
    %29 = vector.broadcast %cst_24 : f32 to vector<1x16xf32>
    %30 = arith.addf %29, %28 : vector<1x16xf32>
    %cst_25 = arith.constant 1.000000e+00 : f32
    %31 = vector.broadcast %cst_25 : f32 to vector<1x16xf32>
    %32 = arith.divf %31, %30 : vector<1x16xf32>
    %cst_26 = arith.constant dense<0xFF800000> : vector<1xf32>
    %33 = vector.multi_reduction <maximumf>, %25, %cst_26 [1] : vector<1x16xf32> to vector<1xf32>
    %34 = vector.shape_cast %33 : vector<1xf32> to vector<1x1xf32>
    %cst_27 = arith.constant dense<0xFF800000> : vector<1xf32>
    %35 = vector.multi_reduction <maximumf>, %32, %cst_27 [1] : vector<1x16xf32> to vector<1xf32>
    %36 = vector.shape_cast %35 : vector<1xf32> to vector<1x1xf32>
    %37 = arith.maximumf %34, %36 : vector<1x1xf32>
    %38 = vector.broadcast %37 : vector<1x1xf32> to vector<1x16xf32>
    %39 = arith.subf %25, %38 : vector<1x16xf32>
    %40 = math.exp %39 : vector<1x16xf32>
    %41 = vector.broadcast %37 : vector<1x1xf32> to vector<1x16xf32>
    %42 = arith.subf %32, %41 : vector<1x16xf32>
    %43 = math.exp %42 : vector<1x16xf32>
    %cst_28 = arith.constant dense<0.000000e+00> : vector<1xf32>
    %44 = vector.multi_reduction <add>, %40, %cst_28 [1] : vector<1x16xf32> to vector<1xf32>
    %45 = vector.shape_cast %44 : vector<1xf32> to vector<1x1xf32>
    %cst_29 = arith.constant dense<0.000000e+00> : vector<1xf32>
    %46 = vector.multi_reduction <add>, %43, %cst_29 [1] : vector<1x16xf32> to vector<1xf32>
    %47 = vector.shape_cast %46 : vector<1xf32> to vector<1x1xf32>
    %48 = arith.addf %45, %47 : vector<1x1xf32>
    %49 = tpu.reciprocal %48 {approx = true} : vector<1x1xf32> -> vector<1x1xf32>
    %50 = arith.mulf %48, %49 : vector<1x1xf32>
    %cst_30 = arith.constant 2.000000e+00 : f32
    %51 = vector.broadcast %cst_30 : f32 to vector<1x1xf32>
    %52 = arith.subf %51, %50 : vector<1x1xf32>
    %53 = arith.mulf %49, %52 : vector<1x1xf32>
    %54 = vector.broadcast %53 : vector<1x1xf32> to vector<1x16xf32>
    %55 = arith.mulf %40, %54 : vector<1x16xf32>
    %56 = vector.broadcast %53 : vector<1x1xf32> to vector<1x16xf32>
    %57 = arith.mulf %43, %56 : vector<1x16xf32>
    %58 = vector.shape_cast %55 : vector<1x16xf32> to vector<1x16x1xf32>
    %59 = vector.broadcast %58 : vector<1x16x1xf32> to vector<1x16x240xf32>
    %60 = arith.mulf %0, %59 : vector<1x16x240xf32>
    %61 = vector.shape_cast %57 : vector<1x16xf32> to vector<1x16x1xf32>
    %62 = vector.broadcast %61 : vector<1x16x1xf32> to vector<1x16x240xf32>
    %63 = arith.mulf %1, %62 : vector<1x16x240xf32>
    %64 = arith.addf %60, %63 : vector<1x16x240xf32>
    %c0_31 = arith.constant 0 : index
    %c0_32 = arith.constant 0 : index
    %c0_33 = arith.constant 0 : index
    %65 = vector.load %arg7[%c0_31, %c0_32, %c0_33] : memref<1x16x240xf32, #tpu.memory_space<vmem>>, vector<1x16x240xf32>
    tpu.vector_store %arg7[%c0_31, %c0_32, %c0_33], %64 {strides = array<i32>} : memref<1x16x240xf32, #tpu.memory_space<vmem>>, vector<1x16x240xf32>,
    return
  }
  func.func @transform_0(%arg0: i32) -> (i32, i32, i32) {
    %c0_i32 = arith.constant 0 : i32
    %c0_i32_0 = arith.constant 0 : i32
    %c0_i32_1 = arith.constant 0 : i32
    return %arg0, %c0_i32, %c0_i32_0 : i32, i32, i32
  }
  func.func @transform_1(%arg0: i32) -> (i32, i32, i32) {
    %c0_i32 = arith.constant 0 : i32
    %c0_i32_0 = arith.constant 0 : i32
    %c0_i32_1 = arith.constant 0 : i32
    return %arg0, %c0_i32, %c0_i32_0 : i32, i32, i32
  }
  func.func @transform_2(%arg0: i32) -> (i32, i32) {
    %c0_i32 = arith.constant 0 : i32
    %c0_i32_0 = arith.constant 0 : i32
    %c0_i32_1 = arith.constant 0 : i32
    return %c0_i32, %c0_i32_0 : i32, i32
  }
  func.func @transform_3(%arg0: i32) -> (i32, i32) {
    %c0_i32 = arith.constant 0 : i32
    %c0_i32_0 = arith.constant 0 : i32
    %c0_i32_1 = arith.constant 0 : i32
    return %c0_i32, %c0_i32_0 : i32, i32
  }
  func.func @transform_4(%arg0: i32) -> (i32, i32) {
    %c0_i32 = arith.constant 0 : i32
    %c0_i32_0 = arith.constant 0 : i32
    %c0_i32_1 = arith.constant 0 : i32
    return %c0_i32, %c0_i32_0 : i32, i32
  }
  func.func @transform_5(%arg0: i32) -> (i32, i32) {
    %c0_i32 = arith.constant 0 : i32
    %c0_i32_0 = arith.constant 0 : i32
    %c0_i32_1 = arith.constant 0 : i32
    return %c0_i32, %c0_i32_0 : i32, i32
  }
  func.func @transform_6(%arg0: i32) -> (i32, i32, i32) {
    %c0_i32 = arith.constant 0 : i32
    %c0_i32_0 = arith.constant 0 : i32
    %c0_i32_1 = arith.constant 0 : i32
    return %arg0, %c0_i32, %c0_i32_0 : i32, i32, i32
  }
}

</mosaic_0001>

<bundles_post_ra>
// kernel: tpu_custom_call.1
= control target key start
LH: loop header
LB: loop body
LE: loop exit
PB: predicated region body
PF: predicated region fallthrough
CT: control target
= control target key end

     0   :  { %11 = vsyncpa [#allocation3], 0  ;;  %s1265_s0 = inlined_call_operand.vmem [shape: f32[2,16,240], index: 0, kind: input, shape index: {}]   ;;  %s1266_s1 = inlined_call_operand.hbm [shape: f32[2,16,240], index: 1, kind: input, shape index: {}]   ;;  %s1267_s2 = inlined_call_operand.hbm [shape: f32[32,64], index: 2, kind: input, shape index: {}]   ;;  %s1268_s3 = inlined_call_operand.vmem [shape: f32[2,16], index: 3, kind: input, shape index: {}]   ;;  %s1269_s4 = inlined_call_operand.hbm [shape: f32[2,16], index: 4, kind: input, shape index: {}]   ;;  %s1270_s5 = inlined_call_operand.vmem [shape: f32[64,2], index: 5, kind: input, shape index: {}]   ;;  %s1271_s6 = inlined_call_operand.hbm [shape: f32[2,16,240], index: 6, kind: output, shape index: {}]  }
   0x1   :  { %13 = vsyncpa [#allocation3 + $0x1], 0 }
   0x2   :  { %14 = vsyncpa [#allocation6], 0 }
   0x3   :  { %15 = vsyncpa [#allocation4], 0 }
   0x4   :  { %17 = vsyncpa [#allocation4 + $0x1], 0  ;;  %s1042_s21 = smov 0   ;;  %s1044_s22 = smov 0  }
   0x5   :  { %s1046_s23 = smov 0   ;;  %s1048_s24 = smov 0  }
   0x6 LB: > { %s1063_s25 = sadd.s32 4294967295, %s996_s24   ;;  %s716_s26 = sadd.s32 4294967294, %s996_s24   ;;  %s996_s24 = sphi %s1048_s24, %s1281_s24   ;;  %s992_s23 = sphi %s1046_s23, %s1280_s23   ;;  %s988_s22 = sphi %s1044_s22, %s1279_s22   ;;  %s984_s21 = sphi %s1042_s21, %s1278_s21  }
   0x7   : > { %p69_p0 = scmp.ne.s32.totalorder %s988_s22, %s984_s21  ;;  %p70_p1 = scmp.eq.s32.totalorder %s1063_s25, 0 }
   0x8   : > { %p177_p2 = scmp.eq.s32.totalorder %s1063_s25, 1  ;;  %p183_p3 = scmp.eq.s32.totalorder %s716_s26, 1 }
   0x9   : > { %p1072_p4 = por %p70_p1, %p69_p0  ;;  %p717_p5 = scmp.ge.s32.totalorder %s996_s24, 1 }
   0xa   : > { %p1077_p6 = por %p183_p3, %p69_p0  ;;  %p190_p7 = scmp.lt.s32.totalorder %s996_s24, 3 }
   0xb   : > { %s201_s7 = sshll.u32 %s1267_s2, 4  ;;  %s998_s9 = smov [#allocation5]   ;;  %s202_s7 = int_to_ptr.hbm [resolvable:$true] %s201_s7 }
   0xc   : > { %p1085_p8 = pnand %p717_p5, %p190_p7  ;;  %s203_s10 = sshll.u32 %s998_s9, 4  ;;  %s204_s10 = int_to_ptr.vmem [resolvable:$true] %s203_s10 }
   0xd   : > { %s219_s13 = sshll.u32 %s1269_s4, 4  ;;  %s999_s14 = smov 128   ;;  %s220_s13 = int_to_ptr.hbm [resolvable:$true] %s219_s13 }
   0xe   : > { %p757_p9 = pneg %p1085_p8  ;;  %s1000_s15 = smov 8  }
   0xf   : > { %s1001_s16 = smov [#allocation7]   ;;  %s1098_s18 = sadd.s32 1, %s996_s24  }
  0x10   : > { %p758_p10 = pnand %p757_p9, %p70_p1  ;;  %s221_s17 = sshll.u32 %s1001_s16, 4  ;;  %s222_s17 = int_to_ptr.vmem [resolvable:$true] %s221_s17 }
  0x11   : > { %s56_s19 = sadd.s32 1, %s992_s23  ;;  %s53_s20 = ssub.s32 %s996_s24, %s1098_s18 }
  0x12   : > { %760 = dma.hbm_to_vmem [thread:$0]  (!%p758_p10), %s202_s7, 512, %s204_s10, [#allocation6], %s999_s14, %s999_s14, %s1000_s15  }
  0x13   : > { %763 = dma.hbm_to_vmem [thread:$0]  (!%p758_p10), %s220_s13, 32, %s222_s17, [#allocation6]  }
  0x14   : > { %p63_p12 = scmp.ne.s32.totalorder %s992_s23, %s988_s22  ;;  %p54_p13 = scmp.eq.s32.totalorder %s53_s20, 0 }
  0x15   : > { %p64_p0 = scmp.eq.s32.totalorder %s996_s24, 0  ;;  %p774_p5 = scmp.lt.s32.totalorder %s996_s24, 2 }
  0x16   : > { %p1108_p3 = por %p177_p2, %p63_p12  ;;  %s243_s30 = sand.u32 1, %s992_s23  }
  0x17   : > { %s1114_s29 = scalar_select %p54_p13, %s992_s23, %s56_s19  }
  0x18   : > { %p65_p7 = por %p64_p0, %p63_p12  ;;  %s721_s7 = sshll.u32 %s243_s30, 5 }
  0x19   : > { %s742_s9 = sshll.u32 %s996_s24, 5  ;;  %s247_s13 = scalar_lea.vmem [#allocation2], %s721_s7 }
  0x1a   : > { %s252_s12 = scalar_lea.hbm %s1266_s1, %s742_s9  ;;  %s255_s14 = sshll.u32 %s247_s13, 4  ;;  %s256_s14 = int_to_ptr.vmem [resolvable:$true] %s255_s14 }
  0x1b   : > { %s253_s15 = sshll.u32 %s252_s12, 4  ;;  %p1121_p2 = pnand %p774_p5, %p65_p7  ;;  %s254_s15 = int_to_ptr.hbm [resolvable:$true] %s253_s15 }
  0x1c   : > { %s244_s17 = scalar_lea.sflag [#allocation3], %s243_s30  ;;  %s896_s19 = sshra.s32 %s254_s15, 4  ;;  %s897_s19 = int_to_ptr.hbm [resolvable:$true] %s896_s19 }
  0x1d   : > { %s898_s20 = scalar_lea.hbm %s897_s19, 32  ;;  %p900_p10 = pneg %p1121_p2 }
  0x1e   : > { %p899_p9 = scmp.ne.s32.totalorder %s897_s19, %s898_s20  ;;  %s903_s10 = scalar_lea.hbm %s1266_s1, 64 }
  0x1f   : > { %p904_p0 = scmp.lt.s32.totalorder %s897_s19, %s1266_s1  ;;  %p905_p5 = scmp.lt.s32.totalorder %s903_s10, %s898_s20 }
  0x20   : > { %p901_p12 = pnand %p900_p10, %p899_p9 }
  0x21   : > { %p906_p7 = por %p905_p5, %p904_p0 }
  0x22   : > { %p902_p13 = pneg %p901_p12 }
  0x24   : > { %p907_p11 = pnand %p906_p7, %p902_p13 }
  0x26   : > { %910 = shalt.err (!%p907_p11)
}
  0x27   : > { %s1002_s30 = smov 256   ;;  %s1003_s13 = smov 16  }
  0x28   : > { %767 = dma.hbm_to_vmem [thread:$0]  (!%p1121_p2), %s254_s15, 512, %s256_s14, %s244_s17, %s1002_s30, %s1002_s30, %s1003_s13  }
  0x29   : > { %267 = sbr.rel (%p1085_p8) target bundleno = 1008 (0x3f0), region = 44  ;;  %s1138_s9 = sand.u32 (!%p1085_p8), 1, %s988_s22  }
  0x2a   : > { %s725_s19 = sshll.u32 (!%p1085_p8), %s1138_s9, 5  ;;  %s270_s20 = scalar_lea.sflag (!%p1085_p8), [#allocation3], %s1138_s9 }
  0x2b   : > { %s273_s7 = scalar_lea.vmem (!%p1085_p8), [#allocation2], %s725_s19 }
  0x2e   : > { %971 = dma.done.wait (%p1072_p4), %s270_s20, 512  }
  0x2f   : > { %973 = vsyncadd (%p1072_p4), %s270_s20, 4294966784 }
  0x30   : > { %975 = dma.done.wait (%p70_p1), [#allocation6], 544  }
  0x31   : > { %977 = vsyncadd (%p70_p1), [#allocation6], 4294966752  ;;  %p318_p8 = scmp.lt.s32.totalorder %s1063_s25, 1  ;;  %vm331_vm0 = vcmask 916480   ;;  %v1157_v0 = vld [vmem:[%s273_s7] sm:$0xff]  ;;  %v1159_v1 = vld [vmem:[%s273_s7 + $0x8] sm:$0xff]  ;;  %v364_v20 = vlaneseq }
  0x32   : > { %v340_v3 = vsel %vm331_vm0, %v1159_v1, 0.0  ;;  %v1170_v7 = vld [vmem:[%s273_s7 + $0x18] sm:$0xff]  ;;  %v1175_v10 = vld [vmem:[%s273_s7 + $0x10] sm:$0xff]  ;;  %v349_v18 = vld [vmem:[#allocation5 + $0x8] sm:$0xff]  ;;  %vm378_vm1 = vcmask 261312   ;;  %vm369_vm2 = vcmask 130112  }
  0x33   : > { %s319_s8 = scalar_select %p318_p8, %s1063_s25, 1  ;;  %v341_v5 = vadd.f32 %v340_v3, %v1157_v0  ;;  %v344_v11 = vsel %vm331_vm0, %v1170_v7, 0.0  ;;  %v351_v16 = vld [vmem:[#allocation5 + $0x18] sm:$0xff]  ;;  %v350_v17 = vld [vmem:[#allocation5 + $0x10] sm:$0xff]  ;;  %v348_v19 = vld [vmem:[#allocation5] sm:$0xff]  ;;  %v365_v22 = vand.u32 127, %v364_v20 }
  0x34   : > { %v345_v14 = vadd.f32 %v344_v11, %v1175_v10  ;;  %400 = vmatpush.msra.mxu0 %v351_v16  ;;  %vm381_vm3 = vcmask 130048   ;;  %vm384_vm4 = vcmask 261120   ;;  %s1004_s27 = smov 32   ;;  %v361_v37 = vld [vmem:[%s1270_s5 + $0x38] sm:$0xff]  ;;  %v360_v38 = vld [vmem:[%s1270_s5 + $0x30] sm:$0xff]  ;;  %v359_v39 = vld [vmem:[%s1270_s5 + $0x28] sm:$0xff] }
  0x35   : > { %s743_s14 = sshll.u32 %s319_s8, 5  ;;  %342 = vadd.xlane.f32.xlu1 %v341_v5  ;;  %v374_v24 = vadd.s32 4294967280, %v365_v22  ;;  %v376_v25 = vadd.s32 4294967272, %v365_v22  ;;  %v367_v26 = vadd.s32 4294967288, %v365_v22  ;;  %426 = vmatpush.msra.mxu1 %v361_v37  ;;  %v358_v40 = vld [vmem:[%s1270_s5 + $0x20] sm:$0xff]  ;;  %v357_v41 = vld [vmem:[%s1270_s5 + $0x18] sm:$0xff] }
  0x36   : > { %s322_s17 = scalar_lea.vmem %s1265_s0, %s743_s14  ;;  %401 = vmatpush.msra.mxu0 %v350_v17  ;;  %v356_v42 = vld [vmem:[%s1270_s5 + $0x10] sm:$0xff]  ;;  %v355_v43 = vld [vmem:[%s1270_s5 + $0x8] sm:$0xff]  ;;  %v354_v44 = vld [vmem:[%s1270_s5] sm:$0xff]  ;;  %vm414_vm5 = vcmask 523264   ;;  %vm442_vm6 = vcmask 1041408   ;;  %vm438_vm7 = vcmask 15360  }
  0x37   : > { %v1161_v2 = vld [vmem:[%s322_s17] sm:$0xff]  ;;  %v1165_v4 = vld [vmem:[%s322_s17 + $0x8] sm:$0xff]  ;;  %v1173_v9 = vld [vmem:[%s322_s17 + $0x18] sm:$0xff]  ;;  %427 = vmatpush.msra.mxu1 %v360_v38  ;;  %vm527_vm12 = vcmask 122880   ;;  %s744_s20 = sshll.u32 %s1063_s25, 5  ;;  %s317_s7 = scalar_lea.vmem [#allocation8], %s725_s19 }
  0x38   : > { %v332_v6 = vsel %vm331_vm0, %v1165_v4, 0.0  ;;  %v1179_v12 = vld [vmem:[%s322_s17 + $0x10] sm:$0xff]  ;;  %v336_v13 = vsel %vm331_vm0, %v1173_v9, 0.0  ;;  %402 = vmatpush.msra.mxu0 %v349_v18  ;;  %v352_v50 = vld [vmem:[%s1268_s3] sm:$0x3]  ;;  %s608_s15 = scalar_lea.hbm %s1271_s6, %s744_s20  ;;  %s609_s16 = sshll.u32 %s317_s7, 4  ;;  %s610_s16 = int_to_ptr.vmem [resolvable:$true] %s609_s16 }
  0x39   : > { %v333_v8 = vadd.f32 %v332_v6, %v1161_v2  ;;  %v337_v15 = vadd.f32 %v336_v13, %v1179_v12  ;;  %428 = vmatpush.msra.mxu1 %v359_v39  ;;  %v353_v51 = vld [vmem:[#allocation7] sm:$0x3]  ;;  %733 = vmatpush.msk.msra.mxu2 %vm442_vm6, %v352_v50  ;;  %s611_s17 = sshll.u32 %s608_s15, 4  ;;  %s597_s25 = scalar_lea.sflag [#allocation4], %s1138_s9  ;;  %s612_s17 = int_to_ptr.hbm [resolvable:$true] %s611_s17 }
  0x3a   : > { %403 = vmatpush.msra.mxu0 %v348_v19  ;;  %735 = vmatpush.msk.msra.mxu3 %vm442_vm6, %v353_v51  ;;  %s940_s19 = sshra.s32 %s612_s17, 4  ;;  %s946_s12 = scalar_lea.hbm %s1271_s6, 64  ;;  %s941_s19 = int_to_ptr.hbm [resolvable:$true] %s940_s19 }
  0x3b   : > { %334 = vadd.xlane.f32.xlu0 %v333_v8  ;;  %429 = vmatpush.msra.mxu1 %v358_v40  ;;  %p947_p2 = scmp.lt.s32.totalorder %s941_s19, %s1271_s6 }
  0x3d   : > { %346 = vadd.xlane.f32.xlu1 %v345_v14  ;;  %430 = vmatpush.msra.mxu1 %v357_v41  ;;  %v556_v41 = vshrl.u32 %v364_v20, 7 }
  0x3f   : > { %431 = vmatpush.msra.mxu1 %v356_v42  ;;  %819 = vset.pattern.permute.xlu1 %v556_v41  ;;  %v563_v42 = vadd.s32 8, %v556_v41 }
  0x41   : > { %432 = vmatpush.msra.mxu1 %v355_v43  ;;  %821 = vset.pattern.permute.xlu2 %v563_v42 }
  0x42   : > { %820 = vset.pattern.permute.xlu0 %v563_v42 }
  0x43   : > { %338 = vadd.xlane.f32.xlu0 %v337_v15  ;;  %433 = vmatpush.msra.mxu1 %v354_v44 }
  0xa8   : > { %v343_v21 = vpop.xlane.xlu1 %342 }
  0xa9   : > { %v375_v28 = vperm.slane %v343_v21, %v374_v24 }
  0xae   : > { %v335_v23 = vpop.xlane.xlu0 %334 }
  0xaf   : > { %v366_v31 = vperm.slane %v335_v23, %v365_v22 }
  0xb0   : > { %v347_v27 = vpop.xlane.xlu1 %346 }
  0xb1   : > { %v377_v29 = vperm.slane %v347_v27, %v376_v25 }
  0xb3   : > { %v379_v33 = vsel %vm378_vm1, %v377_v29, %v375_v28 }
  0xb6   : > { %v339_v30 = vpop.xlane.xlu0 %338 }
  0xb7   : > { %v368_v32 = vperm.slane %v339_v30, %v367_v26 }
  0xb9   : > { %v370_v34 = vsel %vm369_vm2, %v368_v32, %v366_v31 }
  0xba   : > { %v382_v35 = vsel %vm381_vm3, %v370_v34, %v379_v33 }
  0xbb   : > { %v383_v36 = vmul.f32 0.004166667, %v382_v35 }
  0xbd   : > { %409 = vrot.lane.b32.xlu2 %v383_v36, %s1004_s27  ;;  %731 = vmatmul.msk.f32.vlgmr.msra.gmra.mxu0 %vm384_vm4, %v383_v36  ;;  %s942_s27 = scalar_lea.hbm %s941_s19, 32 }
  0xbe   : > { %p943_p1 = scmp.ne.s32.totalorder %s941_s19, %s942_s27  ;;  %p948_p9 = scmp.lt.s32.totalorder %s946_s12, %s942_s27 }
  0xc0   : > { %p944_p4 = pnand %p943_p1, %p1108_p3  ;;  %p949_p10 = por %p948_p9, %p947_p2 }
  0xc2   : > { %p945_p11 = pneg %p944_p4 }
  0xc4   : > { %p950_p12 = pnand %p949_p10, %p945_p11 }
 0x117   : > { %v410_v45 = vpop.permute.xlu2 %409 }
 0x118   : > { %v412_v48 = vsel %vm384_vm4, %v383_v36, %v410_v45 }
 0x13a   : > { %v405_v46 = vpop.f32.mrf.mxu0 }
 0x13b   : > { %v408_v47 = vmax.f32 %v405_v46, 0.0 }
 0x13d   : > { %v413_v49 = vmul.f32 %v412_v48, %v408_v47 }
 0x13f   : > { %732 = vmatmul.msk.f32.vlgmr.msra.gmra.mxu1 %vm414_vm5, %v413_v49 }
 0x1bc   : > { %v435_v52 = vpop.f32.mrf.mxu1 }
 0x1bd   : > { %734 = vmatmul.msk.f32.vlgmr.msra.gmra.mxu2 %vm438_vm7, %v435_v52  ;;  %736 = vmatmul.msk.f32.vlgmr.msra.gmra.mxu3 %vm438_vm7, %v435_v52 }
 0x240   : > { %v463_v53 = vpop.f32.mrf.mxu2  ;;  %v486_v54 = vpop.f32.mrf.mxu3 }
 0x241   : > { %v489_v55 = vsub.f32 0.0, %v463_v53  ;;  %v508_v56 = vsub.f32 0.0, %v486_v54 }
 0x243   : > { %v490_v57 = vmul.f32 1.442695, %v489_v55  ;;  %v509_v58 = vmul.f32 1.442695, %v508_v56 }
 0x245   : > { %822 = vpow2.f32 %v490_v57 }
 0x246   : > { %824 = vpow2.f32 %v509_v58 }
 0x24b   : > { %v823_v59 = vpop.eup %822 }
 0x24c   : > { %v825_v60 = vpop.eup %824  ;;  %v492_v61 = vadd.f32 1.0, %v823_v59 }
 0x24d   : > { %v511_v62 = vadd.f32 1.0, %v825_v60 }
 0x24e   : > { %826 = vrcp.f32 %v492_v61  ;;  %v504_v13 = vand.u32 2147483648, %v492_v61  ;;  %v502_v16 = vand.u32 2147483647, %v492_v61  ;;  %vm498_vm10 = vweird.f32 %v492_v61 }
 0x24f   : > { %828 = vrcp.f32 %v511_v62  ;;  %v523_v14 = vand.u32 2147483648, %v511_v62  ;;  %v521_v18 = vand.u32 2147483647, %v511_v62  ;;  %vm517_vm11 = vweird.f32 %v511_v62 }
 0x250   : > { %v505_v22 = vor.u32 1.1754944e-38, %v504_v13  ;;  %vm503_vm15 = vcmp.eq.f32.partialorder %v502_v16, 8.507059e+37 }
 0x251   : > { %v524_v23 = vor.u32 1.1754944e-38, %v523_v14  ;;  %vm522_vm1 = vcmp.eq.f32.partialorder %v521_v18, 8.507059e+37 }
 0x254   : > { %v827_v63 = vpop.eup %826 }
 0x255   : > { %v829_v3 = vpop.eup %828  ;;  %v494_v5 = vmul.f32 %v827_v63, %v492_v61  ;;  %vm499_vm8 = vweird.f32 %v827_v63 }
 0x256   : > { %v513_v6 = vmul.f32 %v829_v3, %v511_v62  ;;  %vm518_vm9 = vweird.f32 %v829_v3  ;;  %vm500_vm13 = vmor %vm498_vm10, %vm499_vm8 }
 0x257   : > { %v495_v8 = vsub.f32 1.0, %v494_v5  ;;  %vm519_vm14 = vmor %vm517_vm11, %vm518_vm9 }
 0x258   : > { %v514_v11 = vsub.f32 1.0, %v513_v6 }
 0x259   : > { %v496_v15 = vmul.f32 %v827_v63, %v495_v8 }
 0x25a   : > { %v515_v17 = vmul.f32 %v829_v3, %v514_v11 }
 0x25b   : > { %v497_v19 = vadd.f32 %v827_v63, %v496_v15 }
 0x25c   : > { %v516_v21 = vadd.f32 %v829_v3, %v515_v17 }
 0x25d   : > { %v501_v24 = vsel %vm500_vm13, %v827_v63, %v497_v19 }
 0x25e   : > { %v520_v25 = vsel %vm519_vm14, %v829_v3, %v516_v21  ;;  %v506_v26 = vsel %vm503_vm15, %v505_v22, %v501_v24 }
 0x25f   : > { %v525_v27 = vsel %vm522_vm1, %v524_v23, %v520_v25  ;;  %v528_v28 = vsel %vm527_vm12, %v506_v26, -inf }
 0x260   : > { %v531_v29 = vsel %vm527_vm12, %v525_v27, -inf  ;;  %529 = vmax.xlane.f32.xlu2 %v528_v28 }
 0x261   : > { %532 = vmax.xlane.f32.xlu0 %v531_v29 }
 0x2d3   : > { %v530_v30 = vpop.xlane.xlu2 %529 }
 0x2d4   : > { %v533_v31 = vpop.xlane.xlu0 %532 }
 0x2d5   : > { %v534_v32 = vmax.f32 %v530_v30, %v533_v31 }
 0x2d7   : > { %v535_v33 = vsub.f32 %v506_v26, %v534_v32  ;;  %v538_v34 = vsub.f32 %v525_v27, %v534_v32 }
 0x2d9   : > { %v536_v35 = vmul.f32 1.442695, %v535_v33  ;;  %v539_v36 = vmul.f32 1.442695, %v538_v34 }
 0x2db   : > { %830 = vpow2.f32 %v536_v35 }
 0x2dc   : > { %832 = vpow2.f32 %v539_v36 }
 0x2e1   : > { %v831_v37 = vpop.eup %830 }
 0x2e2   : > { %v833_v38 = vpop.eup %832  ;;  %v541_v39 = vsel %vm527_vm12, %v831_v37, 0.0 }
 0x2e3   : > { %v544_v40 = vsel %vm527_vm12, %v833_v38, 0.0  ;;  %542 = vadd.xlane.f32.xlu1 %v541_v39 }
 0x2e4   : > { %545 = vadd.xlane.f32.xlu0 %v544_v40 }
 0x356   : > { %v543_v43 = vpop.xlane.xlu1 %542 }
 0x357   : > { %v546_v44 = vpop.xlane.xlu0 %545 }
 0x358   : > { %v547_v45 = vadd.f32 %v546_v44, %v543_v43 }
 0x35a   : > { %834 = vrcp.f32 %v547_v45 }
 0x360   : > { %v835_v46 = vpop.eup %834 }
 0x361   : > { %v549_v47 = vmul.f32 %v835_v46, %v547_v45 }
 0x363   : > { %v550_v48 = vsub.f32 2.0, %v549_v47 }
 0x365   : > { %v551_v49 = vmul.f32 %v835_v46, %v550_v48 }
 0x367   : > { %v553_v50 = vmul.f32 %v833_v38, %v551_v49  ;;  %v552_v51 = vmul.f32 %v831_v37, %v551_v49 }
 0x369   : > { %v571_v52 = vperm.slane %v553_v50, 0  ;;  %v554_v53 = vperm.slane %v552_v51, 0 }
 0x36b   : > { %582 = vperm.xlu2 %821, %v571_v52   ;;  %565 = vperm.xlu0 %820, %v554_v53  }
 0x36c   : > { %559 = vperm.xlu1 %819, %v554_v53  }
 0x374   : > { %576 = vperm.xlu1 %819, %v571_v52  }
 0x3c5   : > { %v583_v20 = vpop.permute.xlu2 %582 }
 0x3c6   : > { %v586_v55 = vmul.f32 %v583_v20, %v1175_v10  ;;  %v587_v56 = vmul.f32 %v583_v20, %v1170_v7 }
 0x3dd   : > { %v566_v54 = vpop.permute.xlu0 %565 }
 0x3de   : > { %v569_v57 = vmul.f32 %v566_v54, %v1179_v12  ;;  %v570_v58 = vmul.f32 %v566_v54, %v1173_v9  ;;  %v560_v59 = vpop.permute.xlu1 %559 }
 0x3df   : > { %v567_v9 = vmul.f32 %v560_v59, %v1161_v2  ;;  %v568_v10 = vmul.f32 %v560_v59, %v1165_v4 }
 0x3e0   : > { %v590_v60 = vadd.f32 %v586_v55, %v569_v57  ;;  %v591_v61 = vadd.f32 %v587_v56, %v570_v58 }
 0x3e2   : > { %594 = vst [vmem:[%s317_s7 + $0x10] sm:$0xff] %v590_v60 }
 0x3e3   : > { %595 = vst.msk [vmem:[%s317_s7 + $0x18] sm:$0xff] %vm331_vm0, %v591_v61 }
 0x3e6   : > { %v577_v7 = vpop.permute.xlu1 %576 }
 0x3e7   : > { %v584_v12 = vmul.f32 %v577_v7, %v1157_v0  ;;  %v585_v62 = vmul.f32 %v577_v7, %v1159_v1 }
 0x3e9   : > { %v588_v63 = vadd.f32 %v584_v12, %v567_v9  ;;  %v589_v3 = vadd.f32 %v585_v62, %v568_v10 }
 0x3eb   : > { %592 = vst [vmem:[%s317_s7] sm:$0xff] %v588_v63 }
 0x3ec   : > { %593 = vst.msk [vmem:[%s317_s7 + $0x8] sm:$0xff] %vm331_vm0, %v589_v3 }
 0x3ed   : > { %953 = shalt.err (!%p950_p12)
}
 0x3ee   : > { %s1005_s9 = smov 256   ;;  %s1006_s20 = smov 16  }
 0x3ef   : > { %755 = dma.vmem_to_hbm [thread:$0]  (%p1108_p3), %s610_s16, 512, %s612_s17, %s597_s25, %s1005_s9, %s1005_s9, %s1006_s20  }
 0x3f0 PF: > { %s626_s7 = sand.u32 1, %s984_s21   ;;  %p1277_p13 = scmp.ge.s32.totalorder %s996_s24, 2 }
 0x3f1   : > { %s627_s8 = scalar_lea.sflag [#allocation4], %s626_s7 }
 0x3f2   : > { %p769_p0 = pnand %p1277_p13, %p1077_p6 }
 0x3f4   : > { %p770_p5 = pneg %p769_p0 }
 0x3f6   : > { %979 = dma.done.wait (%p770_p5), %s627_s8, 512  }
 0x3f7   : > { %981 = vsyncadd (%p770_p5), %s627_s8, 4294966784  ;;  %p20_p7 = scmp.ge.s32.totalorder %s1098_s18, 4   ;;  %s1278_s21 = smov %s988_s22 }
 0x3f8   : > { %s1279_s22 = smov %s992_s23  ;;  %s1280_s23 = smov %s1114_s29 }
 0x3f9   : > { %s1281_s24 = smov %s1098_s18  ;;  %22 = sbr.rel (!%p20_p7) target bundleno = 6 (0x6), region = 100 }
 0x3fe   :  { %633 = vsyncpa [#allocation3], 1 }
 0x3ff   :  { %635 = vsyncpa [#allocation3 + $0x1], 1 }
 0x400   :  { %636 = vsyncpa [#allocation6], 1 }
 0x401   :  { %637 = vsyncpa [#allocation4], 1 }
 0x402   :  { %639 = vsyncpa [#allocation4 + $0x1], 1 }

// kernel: tpu_custom_call.1
= control target key start
LH: loop header
LB: loop body
LE: loop exit
PB: predicated region body
PF: predicated region fallthrough
CT: control target
= control target key end

     0   :  { %11 = vsyncpa [#allocation3], 0  ;;  %s1265_s0 = inlined_call_operand.vmem [shape: f32[2,16,240], index: 0, kind: input, shape index: {}]   ;;  %s1266_s1 = inlined_call_operand.hbm [shape: f32[2,16,240], index: 1, kind: input, shape index: {}]   ;;  %s1267_s2 = inlined_call_operand.hbm [shape: f32[32,64], index: 2, kind: input, shape index: {}]   ;;  %s1268_s3 = inlined_call_operand.vmem [shape: f32[2,16], index: 3, kind: input, shape index: {}]   ;;  %s1269_s4 = inlined_call_operand.hbm [shape: f32[2,16], index: 4, kind: input, shape index: {}]   ;;  %s1270_s5 = inlined_call_operand.vmem [shape: f32[64,2], index: 5, kind: input, shape index: {}]   ;;  %s1271_s6 = inlined_call_operand.hbm [shape: f32[2,16,240], index: 6, kind: output, shape index: {}]  }
   0x1   :  { %13 = vsyncpa [#allocation3 + $0x1], 0 }
   0x2   :  { %14 = vsyncpa [#allocation6], 0 }
   0x3   :  { %15 = vsyncpa [#allocation4], 0 }
   0x4   :  { %17 = vsyncpa [#allocation4 + $0x1], 0  ;;  %s1042_s21 = smov 0   ;;  %s1044_s22 = smov 0  }
   0x5   :  { %s1046_s23 = smov 0   ;;  %s1048_s24 = smov 0  }
   0x6 LB: > { %s1063_s25 = sadd.s32 4294967295, %s996_s24   ;;  %s716_s26 = sadd.s32 4294967294, %s996_s24   ;;  %s996_s24 = sphi %s1048_s24, %s1281_s24   ;;  %s992_s23 = sphi %s1046_s23, %s1280_s23   ;;  %s988_s22 = sphi %s1044_s22, %s1279_s22   ;;  %s984_s21 = sphi %s1042_s21, %s1278_s21  }
   0x7   : > { %p69_p0 = scmp.ne.s32.totalorder %s988_s22, %s984_s21  ;;  %p70_p1 = scmp.eq.s32.totalorder %s1063_s25, 0 }
   0x8   : > { %p177_p2 = scmp.eq.s32.totalorder %s1063_s25, 1  ;;  %p183_p3 = scmp.eq.s32.totalorder %s716_s26, 1 }
   0x9   : > { %p1072_p4 = por %p70_p1, %p69_p0  ;;  %p717_p5 = scmp.ge.s32.totalorder %s996_s24, 1 }
   0xa   : > { %p1077_p6 = por %p183_p3, %p69_p0  ;;  %p190_p7 = scmp.lt.s32.totalorder %s996_s24, 3 }
   0xb   : > { %s201_s7 = sshll.u32 %s1267_s2, 4  ;;  %s998_s9 = smov [#allocation5]   ;;  %s202_s7 = int_to_ptr.hbm [resolvable:$true] %s201_s7 }
   0xc   : > { %p1085_p8 = pnand %p717_p5, %p190_p7  ;;  %s203_s10 = sshll.u32 %s998_s9, 4  ;;  %s204_s10 = int_to_ptr.vmem [resolvable:$true] %s203_s10 }
   0xd   : > { %s219_s13 = sshll.u32 %s1269_s4, 4  ;;  %s999_s14 = smov 128   ;;  %s220_s13 = int_to_ptr.hbm [resolvable:$true] %s219_s13 }
   0xe   : > { %p757_p9 = pneg %p1085_p8  ;;  %s1000_s15 = smov 8  }
   0xf   : > { %s1001_s16 = smov [#allocation7]   ;;  %s1098_s18 = sadd.s32 1, %s996_s24  }
  0x10   : > { %p758_p10 = pnand %p757_p9, %p70_p1  ;;  %s221_s17 = sshll.u32 %s1001_s16, 4  ;;  %s222_s17 = int_to_ptr.vmem [resolvable:$true] %s221_s17 }
  0x11   : > { %s56_s19 = sadd.s32 1, %s992_s23  ;;  %s53_s20 = ssub.s32 %s996_s24, %s1098_s18 }
  0x12   : > { %760 = dma.hbm_to_vmem [thread:$0]  (!%p758_p10), %s202_s7, 512, %s204_s10, [#allocation6], %s999_s14, %s999_s14, %s1000_s15  }
  0x13   : > { %763 = dma.hbm_to_vmem [thread:$0]  (!%p758_p10), %s220_s13, 32, %s222_s17, [#allocation6]  }
  0x14   : > { %p63_p12 = scmp.ne.s32.totalorder %s992_s23, %s988_s22  ;;  %p54_p13 = scmp.eq.s32.totalorder %s53_s20, 0 }
  0x15   : > { %p64_p0 = scmp.eq.s32.totalorder %s996_s24, 0  ;;  %p774_p5 = scmp.lt.s32.totalorder %s996_s24, 2 }
  0x16   : > { %p1108_p3 = por %p177_p2, %p63_p12  ;;  %s243_s30 = sand.u32 1, %s992_s23  }
  0x17   : > { %s1114_s29 = scalar_select %p54_p13, %s992_s23, %s56_s19  }
  0x18   : > { %p65_p7 = por %p64_p0, %p63_p12  ;;  %s721_s7 = sshll.u32 %s243_s30, 5 }
  0x19   : > { %s742_s9 = sshll.u32 %s996_s24, 5  ;;  %s247_s13 = scalar_lea.vmem [#allocation2], %s721_s7 }
  0x1a   : > { %s252_s12 = scalar_lea.hbm %s1266_s1, %s742_s9  ;;  %s255_s14 = sshll.u32 %s247_s13, 4  ;;  %s256_s14 = int_to_ptr.vmem [resolvable:$true] %s255_s14 }
  0x1b   : > { %s253_s15 = sshll.u32 %s252_s12, 4  ;;  %p1121_p2 = pnand %p774_p5, %p65_p7  ;;  %s254_s15 = int_to_ptr.hbm [resolvable:$true] %s253_s15 }
  0x1c   : > { %s244_s17 = scalar_lea.sflag [#allocation3], %s243_s30  ;;  %s896_s19 = sshra.s32 %s254_s15, 4  ;;  %s897_s19 = int_to_ptr.hbm [resolvable:$true] %s896_s19 }
  0x1d   : > { %s898_s20 = scalar_lea.hbm %s897_s19, 32  ;;  %p900_p10 = pneg %p1121_p2 }
  0x1e   : > { %p899_p9 = scmp.ne.s32.totalorder %s897_s19, %s898_s20  ;;  %s903_s10 = scalar_lea.hbm %s1266_s1, 64 }
  0x1f   : > { %p904_p0 = scmp.lt.s32.totalorder %s897_s19, %s1266_s1  ;;  %p905_p5 = scmp.lt.s32.totalorder %s903_s10, %s898_s20 }
  0x20   : > { %p901_p12 = pnand %p900_p10, %p899_p9 }
  0x21   : > { %p906_p7 = por %p905_p5, %p904_p0 }
  0x22   : > { %p902_p13 = pneg %p901_p12 }
  0x24   : > { %p907_p11 = pnand %p906_p7, %p902_p13 }
  0x26   : > { %910 = shalt.err (!%p907_p11)
}
  0x27   : > { %s1002_s30 = smov 256   ;;  %s1003_s13 = smov 16  }
  0x28   : > { %767 = dma.hbm_to_vmem [thread:$0]  (!%p1121_p2), %s254_s15, 512, %s256_s14, %s244_s17, %s1002_s30, %s1002_s30, %s1003_s13  }
  0x29   : > { %267 = sbr.rel (%p1085_p8) target bundleno = 1008 (0x3f0), region = 44  ;;  %s1138_s9 = sand.u32 (!%p1085_p8), 1, %s988_s22  }
  0x2a   : > { %s725_s19 = sshll.u32 (!%p1085_p8), %s1138_s9, 5  ;;  %s270_s20 = scalar_lea.sflag (!%p1085_p8), [#allocation3], %s1138_s9 }
  0x2b   : > { %s273_s7 = scalar_lea.vmem (!%p1085_p8), [#allocation2], %s725_s19 }
  0x2e   : > { %971 = dma.done.wait (%p1072_p4), %s270_s20, 512  }
  0x2f   : > { %973 = vsyncadd (%p1072_p4), %s270_s20, 4294966784 }
  0x30   : > { %975 = dma.done.wait (%p70_p1), [#allocation6], 544  }
  0x31   : > { %977 = vsyncadd (%p70_p1), [#allocation6], 4294966752  ;;  %p318_p8 = scmp.lt.s32.totalorder %s1063_s25, 1  ;;  %vm331_vm0 = vcmask 916480   ;;  %v1157_v0 = vld [vmem:[%s273_s7] sm:$0xff]  ;;  %v1159_v1 = vld [vmem:[%s273_s7 + $0x8] sm:$0xff]  ;;  %v364_v20 = vlaneseq }
  0x32   : > { %v340_v3 = vsel %vm331_vm0, %v1159_v1, 0.0  ;;  %v1170_v7 = vld [vmem:[%s273_s7 + $0x18] sm:$0xff]  ;;  %v1175_v10 = vld [vmem:[%s273_s7 + $0x10] sm:$0xff]  ;;  %v349_v18 = vld [vmem:[#allocation5 + $0x8] sm:$0xff]  ;;  %vm378_vm1 = vcmask 261312   ;;  %vm369_vm2 = vcmask 130112  }
  0x33   : > { %s319_s8 = scalar_select %p318_p8, %s1063_s25, 1  ;;  %v341_v5 = vadd.f32 %v340_v3, %v1157_v0  ;;  %v344_v11 = vsel %vm331_vm0, %v1170_v7, 0.0  ;;  %v351_v16 = vld [vmem:[#allocation5 + $0x18] sm:$0xff]  ;;  %v350_v17 = vld [vmem:[#allocation5 + $0x10] sm:$0xff]  ;;  %v348_v19 = vld [vmem:[#allocation5] sm:$0xff]  ;;  %v365_v22 = vand.u32 127, %v364_v20 }
  0x34   : > { %v345_v14 = vadd.f32 %v344_v11, %v1175_v10  ;;  %400 = vmatpush.msra.mxu0 %v351_v16  ;;  %vm381_vm3 = vcmask 130048   ;;  %vm384_vm4 = vcmask 261120   ;;  %s1004_s27 = smov 32   ;;  %v361_v37 = vld [vmem:[%s1270_s5 + $0x38] sm:$0xff]  ;;  %v360_v38 = vld [vmem:[%s1270_s5 + $0x30] sm:$0xff]  ;;  %v359_v39 = vld [vmem:[%s1270_s5 + $0x28] sm:$0xff] }
  0x35   : > { %s743_s14 = sshll.u32 %s319_s8, 5  ;;  %342 = vadd.xlane.f32.xlu1 %v341_v5  ;;  %v374_v24 = vadd.s32 4294967280, %v365_v22  ;;  %v376_v25 = vadd.s32 4294967272, %v365_v22  ;;  %v367_v26 = vadd.s32 4294967288, %v365_v22  ;;  %426 = vmatpush.msra.mxu1 %v361_v37  ;;  %v358_v40 = vld [vmem:[%s1270_s5 + $0x20] sm:$0xff]  ;;  %v357_v41 = vld [vmem:[%s1270_s5 + $0x18] sm:$0xff] }
  0x36   : > { %s322_s17 = scalar_lea.vmem %s1265_s0, %s743_s14  ;;  %401 = vmatpush.msra.mxu0 %v350_v17  ;;  %v356_v42 = vld [vmem:[%s1270_s5 + $0x10] sm:$0xff]  ;;  %v355_v43 = vld [vmem:[%s1270_s5 + $0x8] sm:$0xff]  ;;  %v354_v44 = vld [vmem:[%s1270_s5] sm:$0xff]  ;;  %vm414_vm5 = vcmask 523264   ;;  %vm442_vm6 = vcmask 1041408   ;;  %vm438_vm7 = vcmask 15360  }
  0x37   : > { %v1161_v2 = vld [vmem:[%s322_s17] sm:$0xff]  ;;  %v1165_v4 = vld [vmem:[%s322_s17 + $0x8] sm:$0xff]  ;;  %v1173_v9 = vld [vmem:[%s322_s17 + $0x18] sm:$0xff]  ;;  %427 = vmatpush.msra.mxu1 %v360_v38  ;;  %vm527_vm12 = vcmask 122880   ;;  %s744_s20 = sshll.u32 %s1063_s25, 5  ;;  %s317_s7 = scalar_lea.vmem [#allocation8], %s725_s19 }
  0x38   : > { %v332_v6 = vsel %vm331_vm0, %v1165_v4, 0.0  ;;  %v1179_v12 = vld [vmem:[%s322_s17 + $0x10] sm:$0xff]  ;;  %v336_v13 = vsel %vm331_vm0, %v1173_v9, 0.0  ;;  %402 = vmatpush.msra.mxu0 %v349_v18  ;;  %v352_v50 = vld [vmem:[%s1268_s3] sm:$0x3]  ;;  %s608_s15 = scalar_lea.hbm %s1271_s6, %s744_s20  ;;  %s609_s16 = sshll.u32 %s317_s7, 4  ;;  %s610_s16 = int_to_ptr.vmem [resolvable:$true] %s609_s16 }
  0x39   : > { %v333_v8 = vadd.f32 %v332_v6, %v1161_v2  ;;  %v337_v15 = vadd.f32 %v336_v13, %v1179_v12  ;;  %428 = vmatpush.msra.mxu1 %v359_v39  ;;  %v353_v51 = vld [vmem:[#allocation7] sm:$0x3]  ;;  %733 = vmatpush.msk.msra.mxu2 %vm442_vm6, %v352_v50  ;;  %s611_s17 = sshll.u32 %s608_s15, 4  ;;  %s597_s25 = scalar_lea.sflag [#allocation4], %s1138_s9  ;;  %s612_s17 = int_to_ptr.hbm [resolvable:$true] %s611_s17 }
  0x3a   : > { %403 = vmatpush.msra.mxu0 %v348_v19  ;;  %735 = vmatpush.msk.msra.mxu3 %vm442_vm6, %v353_v51  ;;  %s940_s19 = sshra.s32 %s612_s17, 4  ;;  %s946_s12 = scalar_lea.hbm %s1271_s6, 64  ;;  %s941_s19 = int_to_ptr.hbm [resolvable:$true] %s940_s19 }
  0x3b   : > { %334 = vadd.xlane.f32.xlu0 %v333_v8  ;;  %429 = vmatpush.msra.mxu1 %v358_v40  ;;  %p947_p2 = scmp.lt.s32.totalorder %s941_s19, %s1271_s6 }
  0x3d   : > { %346 = vadd.xlane.f32.xlu1 %v345_v14  ;;  %430 = vmatpush.msra.mxu1 %v357_v41  ;;  %v556_v41 = vshrl.u32 %v364_v20, 7 }
  0x3f   : > { %431 = vmatpush.msra.mxu1 %v356_v42  ;;  %819 = vset.pattern.permute.xlu1 %v556_v41  ;;  %v563_v42 = vadd.s32 8, %v556_v41 }
  0x41   : > { %432 = vmatpush.msra.mxu1 %v355_v43  ;;  %821 = vset.pattern.permute.xlu2 %v563_v42 }
  0x42   : > { %820 = vset.pattern.permute.xlu0 %v563_v42 }
  0x43   : > { %338 = vadd.xlane.f32.xlu0 %v337_v15  ;;  %433 = vmatpush.msra.mxu1 %v354_v44 }
  0xa8   : > { %v343_v21 = vpop.xlane.xlu1 %342 }
  0xa9   : > { %v375_v28 = vperm.slane %v343_v21, %v374_v24 }
  0xae   : > { %v335_v23 = vpop.xlane.xlu0 %334 }
  0xaf   : > { %v366_v31 = vperm.slane %v335_v23, %v365_v22 }
  0xb0   : > { %v347_v27 = vpop.xlane.xlu1 %346 }
  0xb1   : > { %v377_v29 = vperm.slane %v347_v27, %v376_v25 }
  0xb3   : > { %v379_v33 = vsel %vm378_vm1, %v377_v29, %v375_v28 }
  0xb6   : > { %v339_v30 = vpop.xlane.xlu0 %338 }
  0xb7   : > { %v368_v32 = vperm.slane %v339_v30, %v367_v26 }
  0xb9   : > { %v370_v34 = vsel %vm369_vm2, %v368_v32, %v366_v31 }
  0xba   : > { %v382_v35 = vsel %vm381_vm3, %v370_v34, %v379_v33 }
  0xbb   : > { %v383_v36 = vmul.f32 0.004166667, %v382_v35 }
  0xbd   : > { %409 = vrot.lane.b32.xlu2 %v383_v36, %s1004_s27  ;;  %731 = vmatmul.msk.f32.vlgmr.msra.gmra.mxu0 %vm384_vm4, %v383_v36  ;;  %s942_s27 = scalar_lea.hbm %s941_s19, 32 }
  0xbe   : > { %p943_p1 = scmp.ne.s32.totalorder %s941_s19, %s942_s27  ;;  %p948_p9 = scmp.lt.s32.totalorder %s946_s12, %s942_s27 }
  0xc0   : > { %p944_p4 = pnand %p943_p1, %p1108_p3  ;;  %p949_p10 = por %p948_p9, %p947_p2 }
  0xc2   : > { %p945_p11 = pneg %p944_p4 }
  0xc4   : > { %p950_p12 = pnand %p949_p10, %p945_p11 }
 0x117   : > { %v410_v45 = vpop.permute.xlu2 %409 }
 0x118   : > { %v412_v48 = vsel %vm384_vm4, %v383_v36, %v410_v45 }
 0x13a   : > { %v405_v46 = vpop.f32.mrf.mxu0 }
 0x13b   : > { %v408_v47 = vmax.f32 %v405_v46, 0.0 }
 0x13d   : > { %v413_v49 = vmul.f32 %v412_v48, %v408_v47 }
 0x13f   : > { %732 = vmatmul.msk.f32.vlgmr.msra.gmra.mxu1 %vm414_vm5, %v413_v49 }
 0x1bc   : > { %v435_v52 = vpop.f32.mrf.mxu1 }
 0x1bd   : > { %734 = vmatmul.msk.f32.vlgmr.msra.gmra.mxu2 %vm438_vm7, %v435_v52  ;;  %736 = vmatmul.msk.f32.vlgmr.msra.gmra.mxu3 %vm438_vm7, %v435_v52 }
 0x240   : > { %v463_v53 = vpop.f32.mrf.mxu2  ;;  %v486_v54 = vpop.f32.mrf.mxu3 }
 0x241   : > { %v489_v55 = vsub.f32 0.0, %v463_v53  ;;  %v508_v56 = vsub.f32 0.0, %v486_v54 }
 0x243   : > { %v490_v57 = vmul.f32 1.442695, %v489_v55  ;;  %v509_v58 = vmul.f32 1.442695, %v508_v56 }
 0x245   : > { %822 = vpow2.f32 %v490_v57 }
 0x246   : > { %824 = vpow2.f32 %v509_v58 }
 0x24b   : > { %v823_v59 = vpop.eup %822 }
 0x24c   : > { %v825_v60 = vpop.eup %824  ;;  %v492_v61 = vadd.f32 1.0, %v823_v59 }
 0x24d   : > { %v511_v62 = vadd.f32 1.0, %v825_v60 }
 0x24e   : > { %826 = vrcp.f32 %v492_v61  ;;  %v504_v13 = vand.u32 2147483648, %v492_v61  ;;  %v502_v16 = vand.u32 2147483647, %v492_v61  ;;  %vm498_vm10 = vweird.f32 %v492_v61 }
 0x24f   : > { %828 = vrcp.f32 %v511_v62  ;;  %v523_v14 = vand.u32 2147483648, %v511_v62  ;;  %v521_v18 = vand.u32 2147483647, %v511_v62  ;;  %vm517_vm11 = vweird.f32 %v511_v62 }
 0x250   : > { %v505_v22 = vor.u32 1.1754944e-38, %v504_v13  ;;  %vm503_vm15 = vcmp.eq.f32.partialorder %v502_v16, 8.507059e+37 }
 0x251   : > { %v524_v23 = vor.u32 1.1754944e-38, %v523_v14  ;;  %vm522_vm1 = vcmp.eq.f32.partialorder %v521_v18, 8.507059e+37 }
 0x254   : > { %v827_v63 = vpop.eup %826 }
 0x255   : > { %v829_v3 = vpop.eup %828  ;;  %v494_v5 = vmul.f32 %v827_v63, %v492_v61  ;;  %vm499_vm8 = vweird.f32 %v827_v63 }
 0x256   : > { %v513_v6 = vmul.f32 %v829_v3, %v511_v62  ;;  %vm518_vm9 = vweird.f32 %v829_v3  ;;  %vm500_vm13 = vmor %vm498_vm10, %vm499_vm8 }
 0x257   : > { %v495_v8 = vsub.f32 1.0, %v494_v5  ;;  %vm519_vm14 = vmor %vm517_vm11, %vm518_vm9 }
 0x258   : > { %v514_v11 = vsub.f32 1.0, %v513_v6 }
 0x259   : > { %v496_v15 = vmul.f32 %v827_v63, %v495_v8 }
 0x25a   : > { %v515_v17 = vmul.f32 %v829_v3, %v514_v11 }
 0x25b   : > { %v497_v19 = vadd.f32 %v827_v63, %v496_v15 }
 0x25c   : > { %v516_v21 = vadd.f32 %v829_v3, %v515_v17 }
 0x25d   : > { %v501_v24 = vsel %vm500_vm13, %v827_v63, %v497_v19 }
 0x25e   : > { %v520_v25 = vsel %vm519_vm14, %v829_v3, %v516_v21  ;;  %v506_v26 = vsel %vm503_vm15, %v505_v22, %v501_v24 }
 0x25f   : > { %v525_v27 = vsel %vm522_vm1, %v524_v23, %v520_v25  ;;  %v528_v28 = vsel %vm527_vm12, %v506_v26, -inf }
 0x260   : > { %v531_v29 = vsel %vm527_vm12, %v525_v27, -inf  ;;  %529 = vmax.xlane.f32.xlu2 %v528_v28 }
 0x261   : > { %532 = vmax.xlane.f32.xlu0 %v531_v29 }
 0x2d3   : > { %v530_v30 = vpop.xlane.xlu2 %529 }
 0x2d4   : > { %v533_v31 = vpop.xlane.xlu0 %532 }
 0x2d5   : > { %v534_v32 = vmax.f32 %v530_v30, %v533_v31 }
 0x2d7   : > { %v535_v33 = vsub.f32 %v506_v26, %v534_v32  ;;  %v538_v34 = vsub.f32 %v525_v27, %v534_v32 }
 0x2d9   : > { %v536_v35 = vmul.f32 1.442695, %v535_v33  ;;  %v539_v36 = vmul.f32 1.442695, %v538_v34 }
 0x2db   : > { %830 = vpow2.f32 %v536_v35 }
 0x2dc   : > { %832 = vpow2.f32 %v539_v36 }
 0x2e1   : > { %v831_v37 = vpop.eup %830 }
 0x2e2   : > { %v833_v38 = vpop.eup %832  ;;  %v541_v39 = vsel %vm527_vm12, %v831_v37, 0.0 }
 0x2e3   : > { %v544_v40 = vsel %vm527_vm12, %v833_v38, 0.0  ;;  %542 = vadd.xlane.f32.xlu1 %v541_v39 }
 0x2e4   : > { %545 = vadd.xlane.f32.xlu0 %v544_v40 }
 0x356   : > { %v543_v43 = vpop.xlane.xlu1 %542 }
 0x357   : > { %v546_v44 = vpop.xlane.xlu0 %545 }
 0x358   : > { %v547_v45 = vadd.f32 %v546_v44, %v543_v43 }
 0x35a   : > { %834 = vrcp.f32 %v547_v45 }
 0x360   : > { %v835_v46 = vpop.eup %834 }
 0x361   : > { %v549_v47 = vmul.f32 %v835_v46, %v547_v45 }
 0x363   : > { %v550_v48 = vsub.f32 2.0, %v549_v47 }
 0x365   : > { %v551_v49 = vmul.f32 %v835_v46, %v550_v48 }
 0x367   : > { %v553_v50 = vmul.f32 %v833_v38, %v551_v49  ;;  %v552_v51 = vmul.f32 %v831_v37, %v551_v49 }
 0x369   : > { %v571_v52 = vperm.slane %v553_v50, 0  ;;  %v554_v53 = vperm.slane %v552_v51, 0 }
 0x36b   : > { %582 = vperm.xlu2 %821, %v571_v52   ;;  %565 = vperm.xlu0 %820, %v554_v53  }
 0x36c   : > { %559 = vperm.xlu1 %819, %v554_v53  }
 0x374   : > { %576 = vperm.xlu1 %819, %v571_v52  }
 0x3c5   : > { %v583_v20 = vpop.permute.xlu2 %582 }
 0x3c6   : > { %v586_v55 = vmul.f32 %v583_v20, %v1175_v10  ;;  %v587_v56 = vmul.f32 %v583_v20, %v1170_v7 }
 0x3dd   : > { %v566_v54 = vpop.permute.xlu0 %565 }
 0x3de   : > { %v569_v57 = vmul.f32 %v566_v54, %v1179_v12  ;;  %v570_v58 = vmul.f32 %v566_v54, %v1173_v9  ;;  %v560_v59 = vpop.permute.xlu1 %559 }
 0x3df   : > { %v567_v9 = vmul.f32 %v560_v59, %v1161_v2  ;;  %v568_v10 = vmul.f32 %v560_v59, %v1165_v4 }
 0x3e0   : > { %v590_v60 = vadd.f32 %v586_v55, %v569_v57  ;;  %v591_v61 = vadd.f32 %v587_v56, %v570_v58 }
 0x3e2   : > { %594 = vst [vmem:[%s317_s7 + $0x10] sm:$0xff] %v590_v60 }
 0x3e3   : > { %595 = vst.msk [vmem:[%s317_s7 + $0x18] sm:$0xff] %vm331_vm0, %v591_v61 }
 0x3e6   : > { %v577_v7 = vpop.permute.xlu1 %576 }
 0x3e7   : > { %v584_v12 = vmul.f32 %v577_v7, %v1157_v0  ;;  %v585_v62 = vmul.f32 %v577_v7, %v1159_v1 }
 0x3e9   : > { %v588_v63 = vadd.f32 %v584_v12, %v567_v9  ;;  %v589_v3 = vadd.f32 %v585_v62, %v568_v10 }
 0x3eb   : > { %592 = vst [vmem:[%s317_s7] sm:$0xff] %v588_v63 }
 0x3ec   : > { %593 = vst.msk [vmem:[%s317_s7 + $0x8] sm:$0xff] %vm331_vm0, %v589_v3 }
 0x3ed   : > { %953 = shalt.err (!%p950_p12)
}
 0x3ee   : > { %s1005_s9 = smov 256   ;;  %s1006_s20 = smov 16  }
 0x3ef   : > { %755 = dma.vmem_to_hbm [thread:$0]  (%p1108_p3), %s610_s16, 512, %s612_s17, %s597_s25, %s1005_s9, %s1005_s9, %s1006_s20  }
 0x3f0 PF: > { %s626_s7 = sand.u32 1, %s984_s21   ;;  %p1277_p13 = scmp.ge.s32.totalorder %s996_s24, 2 }
 0x3f1   : > { %s627_s8 = scalar_lea.sflag [#allocation4], %s626_s7 }
 0x3f2   : > { %p769_p0 = pnand %p1277_p13, %p1077_p6 }
 0x3f4   : > { %p770_p5 = pneg %p769_p0 }
 0x3f6   : > { %979 = dma.done.wait (%p770_p5), %s627_s8, 512  }
 0x3f7   : > { %981 = vsyncadd (%p770_p5), %s627_s8, 4294966784  ;;  %p20_p7 = scmp.ge.s32.totalorder %s1098_s18, 4   ;;  %s1278_s21 = smov %s988_s22 }
 0x3f8   : > { %s1279_s22 = smov %s992_s23  ;;  %s1280_s23 = smov %s1114_s29 }
 0x3f9   : > { %s1281_s24 = smov %s1098_s18  ;;  %22 = sbr.rel (!%p20_p7) target bundleno = 6 (0x6), region = 100 }
 0x3fe   :  { %633 = vsyncpa [#allocation3], 1 }
 0x3ff   :  { %635 = vsyncpa [#allocation3 + $0x1], 1 }
 0x400   :  { %636 = vsyncpa [#allocation6], 1 }
 0x401   :  { %637 = vsyncpa [#allocation4], 1 }
 0x402   :  { %639 = vsyncpa [#allocation4 + $0x1], 1 }

</bundles_post_ra>
